<compile_context>
chip_gen: v7x
topology: tpu7x:2x2x1
jax: 0.10.0
libtpu: 0.0.40
codegen_flags: <defaults>
</compile_context>

<pallas_src>
import jax
import jax.numpy as jnp
from jax import lax
from jax.experimental import pallas as pl
from jax.experimental.pallas import tpu as pltpu

EMB = 100   # nn.Embedding(max_words, 100)
H = 32      # LSTM hidden size (bidirectional -> 64 features)


def _rnn_tanh_kernel(x_ref, b0_ref, wx_ref, whh_ref, bg_ref,
                     w1_ref, b1_ref, w2_ref, b2_ref, out_ref, gx_ref):
    # x_ref : (T, BB, 32) time-major pre-projected embeddings (emb @ w0, no bias/tanh yet)
    # gx_ref: (T, BB, 256) scratch holding input-gate pre-activations for both directions
    #         at each time step, interleaved columns [i_f,i_b,f_f,f_b,g_f,g_b,o_f,o_b],
    #         with the (b_ih + b_hh) biases already folded in.
    T, BB, _ = x_ref.shape
    G = 8 * H

    # fc0 bias + tanh, then the hoisted input projection for BOTH directions:
    # one (T*BB, 32) x (32, 256) MXU matmul and one unmasked lane-dense store.
    a0 = jnp.tanh(x_ref[...].reshape(T * BB, H) + b0_ref[...])
    gx = jnp.dot(a0, wx_ref[...], preferred_element_type=jnp.float32) + bg_ref[...]
    gx_ref[...] = gx.reshape(T, BB, G)

    whh = whh_ref[...]                                   # (64, 256) block-diagonal, resident
    # forward-direction columns are the even 32-wide blocks of the interleaved layout
    fwd_mask = (lax.broadcasted_iota(jnp.int32, (BB, G), 1) % (2 * H)) < H
    zeros = jnp.zeros((BB, 2 * H), jnp.float32)

    def step(s, carry):
        # h, c, acc are (BB, 64) = [forward half | backward half]
        h, c, acc = carry
        # forward gates consume time s, backward gates consume time T-1-s
        g_in = jnp.where(fwd_mask, gx_ref[s], gx_ref[T - 1 - s])
        gates = g_in + jnp.dot(h, whh, preferred_element_type=jnp.float32)
        i = jax.nn.sigmoid(gates[:, 0:2 * H])            # [i_f | i_b]
        f = jax.nn.sigmoid(gates[:, 2 * H:4 * H])        # [f_f | f_b]
        g = jnp.tanh(gates[:, 4 * H:6 * H])              # [g_f | g_b]
        o = jax.nn.sigmoid(gates[:, 6 * H:8 * H])        # [o_f | o_b]
        c_new = f * c + i * g
        h_new = o * jnp.tanh(c_new)
        return h_new, c_new, acc + h_new

    _, _, acc = lax.fori_loop(0, T, step, (zeros, zeros, zeros), unroll=True)

    # F.avg_pool2d over time + squeeze == mean over time; acc layout is already [fwd | bwd],
    # matching torch's concat(h_fwd, h_bwd) feature order expected by fc1.
    pooled = acc * (1.0 / T)
    h1 = jnp.tanh(jnp.dot(pooled, w1_ref[...], preferred_element_type=jnp.float32)
                  + b1_ref[...])
    out_ref[...] = (jnp.dot(h1, w2_ref[...], preferred_element_type=jnp.float32)
                    + b2_ref[...])


def _interleave_gate_cols(wf, wb):
    # wf, wb: (R, 4H) in PyTorch gate order [i, f, g, o] per direction.
    # Returns (R, 8H) with columns [i_f, i_b, f_f, f_b, g_f, g_b, o_f, o_b].
    R = wf.shape[0]
    return jnp.stack([wf.reshape(R, 4, H), wb.reshape(R, 4, H)], axis=2).reshape(R, 8 * H)


def rnn_tanh_forward(token_ids, params):
    B, T = token_ids.shape

    # Fold fc0's weight into the embedding table (linear ops commute with the gather).
    emb_proj = jnp.dot(params["emb"], params["w0"], precision=lax.Precision.HIGHEST)
    x = jnp.take(emb_proj, token_ids, axis=0).astype(jnp.float32)      # (B, T, 32)

    # Pad the batch to a sublane multiple and tile at <= 128 rows per grid step.
    block_b = min(128, ((max(B, 1) + 7) // 8) * 8)
    b_pad = pl.cdiv(B, block_b) * block_b
    if b_pad != B:
        x = jnp.pad(x, ((0, b_pad - B), (0, 0), (0, 0)))
    x = jnp.swapaxes(x, 0, 1)                                          # (T, B_pad, 32) time-major

    # Combined gate weights (interleaved layout, see kernel).
    wx_big = _interleave_gate_cols(params["wih_f"], params["wih_b"])   # (32, 256)
    z = jnp.zeros_like(params["whh_f"])
    whh_big = jnp.concatenate([_interleave_gate_cols(params["whh_f"], z),
                               _interleave_gate_cols(z, params["whh_b"])], axis=0)  # (64, 256)
    bg_big = _interleave_gate_cols(params["bg_f"], params["bg_b"])     # (1, 256)

    const2 = lambda b: (0, 0)   # weights stay resident across the batch grid
    out = pl.pallas_call(
        _rnn_tanh_kernel,
        out_shape=jax.ShapeDtypeStruct((b_pad, 2), jnp.float32),
        grid=(b_pad // block_b,),
        in_specs=[
            pl.BlockSpec((T, block_b, H), lambda b: (0, b, 0)),        # x (time-major)
            pl.BlockSpec((1, H), const2),                              # b0
            pl.BlockSpec((H, 8 * H), const2),                          # combined W_ih
            pl.BlockSpec((2 * H, 8 * H), const2),                      # block-diag W_hh
            pl.BlockSpec((1, 8 * H), const2),                          # combined gate bias
            pl.BlockSpec((2 * H, 16), const2),                         # w1
            pl.BlockSpec((1, 16), const2),                             # b1
            pl.BlockSpec((16, 2), const2),                             # w2
            pl.BlockSpec((1, 2), const2),                              # b2
        ],
        out_specs=pl.BlockSpec((block_b, 2), lambda b: (b, 0)),
        scratch_shapes=[pltpu.VMEM((T, block_b, 8 * H), jnp.float32)],
        compiler_params=pltpu.CompilerParams(dimension_semantics=("parallel",)),
    )(x, params["b0"], wx_big, whh_big, bg_big,
      params["w1"], params["b1"], params["w2"], params["b2"])
    return out[:B]


def init_params(key, max_words=20000, emb_size=EMB, hidden=H):
    ks = jax.random.split(key, 12)

    def unif(k, shape, fan_in):
        bound = 1.0 / (fan_in ** 0.5)
        return jax.random.uniform(k, shape, jnp.float32, -bound, bound)

    return {
        # nn.Embedding(max_words, emb_size): N(0, 1)
        "emb": jax.random.normal(ks[0], (max_words, emb_size), jnp.float32),
        # fc0: Linear(emb_size, 32)   (stored transposed: (in, out))
        "w0": unif(ks[1], (emb_size, hidden), emb_size),
        "b0": unif(ks[2], (1, hidden), emb_size),
        # LSTM(32, 32, bidirectional) — weights transposed to (in, 4H); bg = b_ih + b_hh
        "wih_f": unif(ks[3], (hidden, 4 * hidden), hidden),
        "whh_f": unif(ks[4], (hidden, 4 * hidden), hidden),
        "bg_f": unif(ks[5], (1, 4 * hidden), hidden),
        "wih_b": unif(ks[6], (hidden, 4 * hidden), hidden),
        "whh_b": unif(ks[7], (hidden, 4 * hidden), hidden),
        "bg_b": unif(ks[8], (1, 4 * hidden), hidden),
        # fc1: Linear(64, 16), fc2: Linear(16, 2)
        "w1": unif(ks[9], (2 * hidden, 16), 2 * hidden),
        "b1": unif(ks[10], (1, 16), 2 * hidden),
        "w2": unif(ks[11], (16, 2), 16),
        "b2": jnp.zeros((1, 2), jnp.float32),
    }


def rnn_tanh_reference(token_ids, params):
    """Pure-JAX reference mirroring the PyTorch forward."""
    with jax.default_matmul_precision("highest"):
        x = jnp.take(params["emb"], token_ids, axis=0).astype(jnp.float32)
        x = jnp.tanh(x @ params["w0"] + params["b0"])
        B, T, _ = x.shape

        def cell(wih, whh, bg):
            def step(carry, x_t):
                h, c = carry
                gates = x_t @ wih + h @ whh + bg
                i, f, g, o = jnp.split(gates, 4, axis=-1)
                c_new = jax.nn.sigmoid(f) * c + jax.nn.sigmoid(i) * jnp.tanh(g)
                h_new = jax.nn.sigmoid(o) * jnp.tanh(c_new)
                return (h_new, c_new), h_new
            return step

        h0 = jnp.zeros((B, H), jnp.float32)
        c0 = jnp.zeros((B, H), jnp.float32)
        xs_tm = jnp.swapaxes(x, 0, 1)                         # (T, B, H)
        _, hs_f = lax.scan(cell(params["wih_f"], params["whh_f"], params["bg_f"]),
                           (h0, c0), xs_tm)
        _, hs_b = lax.scan(cell(params["wih_b"], params["whh_b"], params["bg_b"]),
                           (h0, c0), xs_tm[::-1])
        pooled = jnp.concatenate([hs_f.mean(0), hs_b.mean(0)], axis=-1)  # avg_pool2d+squeeze
        h1 = jnp.tanh(pooled @ params["w1"] + params["b1"])
        return h1 @ params["w2"] + params["b2"]


if __name__ == "__main__":
    key = jax.random.PRNGKey(0)
    pkey, xkey = jax.random.split(key)
    params = init_params(pkey)

    B, T = 2, 8
    token_ids = jax.random.randint(xkey, (B, T), 0, 20000, dtype=jnp.int32)

    pred = jax.block_until_ready(rnn_tanh_forward(token_ids, params))
    ref = jax.block_until_ready(rnn_tanh_reference(token_ids, params))

    assert pred.shape == (B, 2), pred.shape
    assert jnp.allclose(pred, ref, rtol=1e-3, atol=1e-3), (pred, ref)
    print("KERNEL_OK")
</pallas_src>

<mosaic_0001>
module attributes {stable_mosaic.version = 11 : i64} {
  func.func @_rnn_tanh_kernel(%arg0: i32, %arg1: memref<8x8x32xf32, #tpu.memory_space<vmem>>, %arg2: memref<1x32xf32, #tpu.memory_space<vmem>>, %arg3: memref<32x256xf32, #tpu.memory_space<vmem>>, %arg4: memref<64x256xf32, #tpu.memory_space<vmem>>, %arg5: memref<1x256xf32, #tpu.memory_space<vmem>>, %arg6: memref<64x16xf32, #tpu.memory_space<vmem>>, %arg7: memref<1x16xf32, #tpu.memory_space<vmem>>, %arg8: memref<16x2xf32, #tpu.memory_space<vmem>>, %arg9: memref<1x2xf32, #tpu.memory_space<vmem>>, %arg10: memref<8x2xf32, #tpu.memory_space<vmem>>, %arg11: memref<8x8x256xf32, #tpu.memory_space<vmem>>) attributes {dimension_semantics = [#tpu.dimension_semantics<parallel>], iteration_bounds = array<i64: 1>, scalar_prefetch = 0 : i64, scratch_operands = 1 : i64, tpu.core_type = #tpu.core_type<tc>, window_params = [{transform_indices = @transform_0, window_bounds = array<i64: 8, 8, 32>}, {pipeline_mode = #tpu.pipeline_mode<synchronous>, transform_indices = @transform_1, window_bounds = array<i64: 1, 32>}, {pipeline_mode = #tpu.pipeline_mode<synchronous>, transform_indices = @transform_2, window_bounds = array<i64: 32, 256>}, {pipeline_mode = #tpu.pipeline_mode<synchronous>, transform_indices = @transform_3, window_bounds = array<i64: 64, 256>}, {pipeline_mode = #tpu.pipeline_mode<synchronous>, transform_indices = @transform_4, window_bounds = array<i64: 1, 256>}, {pipeline_mode = #tpu.pipeline_mode<synchronous>, transform_indices = @transform_5, window_bounds = array<i64: 64, 16>}, {pipeline_mode = #tpu.pipeline_mode<synchronous>, transform_indices = @transform_6, window_bounds = array<i64: 1, 16>}, {pipeline_mode = #tpu.pipeline_mode<synchronous>, transform_indices = @transform_7, window_bounds = array<i64: 16, 2>}, {pipeline_mode = #tpu.pipeline_mode<synchronous>, transform_indices = @transform_8, window_bounds = array<i64: 1, 2>}, {transform_indices = @transform_9, window_bounds = array<i64: 8, 2>}]} {
    %c0 = arith.constant 0 : index
    %c0_0 = arith.constant 0 : index
    %c0_1 = arith.constant 0 : index
    %0 = vector.load %arg1[%c0, %c0_0, %c0_1] : memref<8x8x32xf32, #tpu.memory_space<vmem>>, vector<8x8x32xf32>
    %1 = vector.shape_cast %0 : vector<8x8x32xf32> to vector<64x32xf32>
    %c0_2 = arith.constant 0 : index
    %c0_3 = arith.constant 0 : index
    %2 = vector.load %arg2[%c0_2, %c0_3] : memref<1x32xf32, #tpu.memory_space<vmem>>, vector<1x32xf32>
    %3 = vector.broadcast %2 : vector<1x32xf32> to vector<64x32xf32>
    %4 = arith.addf %1, %3 : vector<64x32xf32>
    %5 = math.tanh %4 : vector<64x32xf32>
    %c0_4 = arith.constant 0 : index
    %c0_5 = arith.constant 0 : index
    %6 = vector.load %arg3[%c0_4, %c0_5] : memref<32x256xf32, #tpu.memory_space<vmem>>, vector<32x256xf32>
    %cst = arith.constant dense<0.000000e+00> : vector<64x256xf32>
    %7 = tpu.matmul %5, %6, %cst {dimension_numbers = #tpu.dot_dimension_numbers<[1], [0], [0], [1], [0, 0, 1, 1], [], []>} : vector<64x32xf32>, vector<32x256xf32>, vector<64x256xf32> -> vector<64x256xf32>
    %c0_6 = arith.constant 0 : index
    %c0_7 = arith.constant 0 : index
    %8 = vector.load %arg5[%c0_6, %c0_7] : memref<1x256xf32, #tpu.memory_space<vmem>>, vector<1x256xf32>
    %9 = vector.broadcast %8 : vector<1x256xf32> to vector<64x256xf32>
    %10 = arith.addf %7, %9 : vector<64x256xf32>
    %11 = vector.shape_cast %10 : vector<64x256xf32> to vector<8x8x256xf32>
    %c0_8 = arith.constant 0 : index
    %c0_9 = arith.constant 0 : index
    %c0_10 = arith.constant 0 : index
    %12 = vector.load %arg11[%c0_8, %c0_9, %c0_10] : memref<8x8x256xf32, #tpu.memory_space<vmem>>, vector<8x8x256xf32>
    tpu.vector_store %arg11[%c0_8, %c0_9, %c0_10], %11 {strides = array<i32>} : memref<8x8x256xf32, #tpu.memory_space<vmem>>, vector<8x8x256xf32>,
    %c0_11 = arith.constant 0 : index
    %c0_12 = arith.constant 0 : index
    %13 = vector.load %arg4[%c0_11, %c0_12] : memref<64x256xf32, #tpu.memory_space<vmem>>, vector<64x256xf32>
    %14 = tpu.iota {dimensions = array<i32: 1>} : vector<8x256xi32>
    %c64_i32 = arith.constant 64 : i32
    %c0_i32 = arith.constant 0 : i32
    %15 = arith.cmpi eq, %c64_i32, %c0_i32 : i32
    %c1_i32 = arith.constant 1 : i32
    %16 = arith.select %15, %c1_i32, %c64_i32 : i32
    %17 = vector.broadcast %16 : i32 to vector<8x256xi32>
    %18 = arith.remsi %14, %17 : vector<8x256xi32>
    %c0_i32_13 = arith.constant 0 : i32
    %19 = vector.broadcast %c0_i32_13 : i32 to vector<8x256xi32>
    %20 = arith.cmpi ne, %18, %19 : vector<8x256xi32>
    %c0_i32_14 = arith.constant 0 : i32
    %21 = vector.broadcast %c0_i32_14 : i32 to vector<8x256xi32>
    %22 = arith.cmpi slt, %18, %21 : vector<8x256xi32>
    %c0_i32_15 = arith.constant 0 : i32
    %23 = arith.cmpi slt, %16, %c0_i32_15 : i32
    %24 = vector.broadcast %23 : i1 to vector<8x256xi1>
    %25 = vector.broadcast %24 : vector<8x256xi1> to vector<8x256xi1>
    %26 = arith.xori %22, %25 : vector<8x256xi1>
    %27 = arith.andi %26, %20 : vector<8x256xi1>
    %28 = vector.broadcast %16 : i32 to vector<8x256xi32>
    %29 = arith.addi %18, %28 : vector<8x256xi32>
    %30 = arith.select %27, %29, %18 : vector<8x256xi1>, vector<8x256xi32>
    %c32_i32 = arith.constant 32 : i32
    %31 = vector.broadcast %c32_i32 : i32 to vector<8x256xi32>
    %32 = arith.cmpi slt, %30, %31 : vector<8x256xi32>
    %cst_16 = arith.constant 0.000000e+00 : f32
    %33 = vector.broadcast %cst_16 : f32 to vector<8x64xf32>
    %c0_i32_17 = arith.constant 0 : i32
    %34 = arith.index_cast %c0_i32_17 : i32 to index
    %c0_18 = arith.constant 0 : index
    %c0_19 = arith.constant 0 : index
    %35 = vector.load %arg11[%34, %c0_18, %c0_19] : memref<8x8x256xf32, #tpu.memory_space<vmem>>, vector<1x8x256xf32>
    %36 = vector.shape_cast %35 : vector<1x8x256xf32> to vector<8x256xf32>
    %c7_i32 = arith.constant 7 : i32
    %37 = arith.subi %c7_i32, %c0_i32_17 : i32
    %38 = arith.index_cast %37 : i32 to index
    %c0_20 = arith.constant 0 : index
    %c0_21 = arith.constant 0 : index
    %39 = vector.load %arg11[%38, %c0_20, %c0_21] : memref<8x8x256xf32, #tpu.memory_space<vmem>>, vector<1x8x256xf32>
    %40 = vector.shape_cast %39 : vector<1x8x256xf32> to vector<8x256xf32>
    %41 = arith.select %32, %36, %40 : vector<8x256xi1>, vector<8x256xf32>
    %cst_22 = arith.constant dense<0.000000e+00> : vector<8x256xf32>
    %42 = tpu.matmul %33, %13, %cst_22 {dimension_numbers = #tpu.dot_dimension_numbers<[1], [0], [0], [1], [0, 0, 1, 1], [], []>} : vector<8x64xf32>, vector<64x256xf32>, vector<8x256xf32> -> vector<8x256xf32>
    %43 = arith.addf %41, %42 : vector<8x256xf32>
    %44 = vector.extract_strided_slice %43 {offsets = [0, 0], sizes = [8, 64], strides = [1, 1]} : vector<8x256xf32> to vector<8x64xf32>
    %45 = arith.negf %44 : vector<8x64xf32>
    %46 = math.exp %45 : vector<8x64xf32>
    %cst_23 = arith.constant 1.000000e+00 : f32
    %47 = vector.broadcast %cst_23 : f32 to vector<8x64xf32>
    %48 = arith.addf %47, %46 : vector<8x64xf32>
    %49 = arith.divf %47, %48 : vector<8x64xf32>
    %50 = vector.extract_strided_slice %43 {offsets = [0, 64], sizes = [8, 64], strides = [1, 1]} : vector<8x256xf32> to vector<8x64xf32>
    %51 = arith.negf %50 : vector<8x64xf32>
    %52 = math.exp %51 : vector<8x64xf32>
    %cst_24 = arith.constant 1.000000e+00 : f32
    %53 = vector.broadcast %cst_24 : f32 to vector<8x64xf32>
    %54 = arith.addf %53, %52 : vector<8x64xf32>
    %55 = arith.divf %53, %54 : vector<8x64xf32>
    %56 = vector.extract_strided_slice %43 {offsets = [0, 128], sizes = [8, 64], strides = [1, 1]} : vector<8x256xf32> to vector<8x64xf32>
    %57 = math.tanh %56 : vector<8x64xf32>
    %58 = vector.extract_strided_slice %43 {offsets = [0, 192], sizes = [8, 64], strides = [1, 1]} : vector<8x256xf32> to vector<8x64xf32>
    %59 = arith.negf %58 : vector<8x64xf32>
    %60 = math.exp %59 : vector<8x64xf32>
    %cst_25 = arith.constant 1.000000e+00 : f32
    %61 = vector.broadcast %cst_25 : f32 to vector<8x64xf32>
    %62 = arith.addf %61, %60 : vector<8x64xf32>
    %63 = arith.divf %61, %62 : vector<8x64xf32>
    %64 = arith.mulf %55, %33 : vector<8x64xf32>
    %65 = arith.mulf %49, %57 : vector<8x64xf32>
    %66 = arith.addf %64, %65 : vector<8x64xf32>
    %67 = math.tanh %66 : vector<8x64xf32>
    %68 = arith.mulf %63, %67 : vector<8x64xf32>
    %69 = arith.addf %33, %68 : vector<8x64xf32>
    %c1_i32_26 = arith.constant 1 : i32
    %70 = arith.index_cast %c1_i32_26 : i32 to index
    %c0_27 = arith.constant 0 : index
    %c0_28 = arith.constant 0 : index
    %71 = vector.load %arg11[%70, %c0_27, %c0_28] : memref<8x8x256xf32, #tpu.memory_space<vmem>>, vector<1x8x256xf32>
    %72 = vector.shape_cast %71 : vector<1x8x256xf32> to vector<8x256xf32>
    %c7_i32_29 = arith.constant 7 : i32
    %73 = arith.subi %c7_i32_29, %c1_i32_26 : i32
    %74 = arith.index_cast %73 : i32 to index
    %c0_30 = arith.constant 0 : index
    %c0_31 = arith.constant 0 : index
    %75 = vector.load %arg11[%74, %c0_30, %c0_31] : memref<8x8x256xf32, #tpu.memory_space<vmem>>, vector<1x8x256xf32>
    %76 = vector.shape_cast %75 : vector<1x8x256xf32> to vector<8x256xf32>
    %77 = arith.select %32, %72, %76 : vector<8x256xi1>, vector<8x256xf32>
    %cst_32 = arith.constant dense<0.000000e+00> : vector<8x256xf32>
    %78 = tpu.matmul %68, %13, %cst_32 {dimension_numbers = #tpu.dot_dimension_numbers<[1], [0], [0], [1], [0, 0, 1, 1], [], []>} : vector<8x64xf32>, vector<64x256xf32>, vector<8x256xf32> -> vector<8x256xf32>
    %79 = arith.addf %77, %78 : vector<8x256xf32>
    %80 = vector.extract_strided_slice %79 {offsets = [0, 0], sizes = [8, 64], strides = [1, 1]} : vector<8x256xf32> to vector<8x64xf32>
    %81 = arith.negf %80 : vector<8x64xf32>
    %82 = math.exp %81 : vector<8x64xf32>
    %cst_33 = arith.constant 1.000000e+00 : f32
    %83 = vector.broadcast %cst_33 : f32 to vector<8x64xf32>
    %84 = arith.addf %83, %82 : vector<8x64xf32>
    %85 = arith.divf %83, %84 : vector<8x64xf32>
    %86 = vector.extract_strided_slice %79 {offsets = [0, 64], sizes = [8, 64], strides = [1, 1]} : vector<8x256xf32> to vector<8x64xf32>
    %87 = arith.negf %86 : vector<8x64xf32>
    %88 = math.exp %87 : vector<8x64xf32>
    %cst_34 = arith.constant 1.000000e+00 : f32
    %89 = vector.broadcast %cst_34 : f32 to vector<8x64xf32>
    %90 = arith.addf %89, %88 : vector<8x64xf32>
    %91 = arith.divf %89, %90 : vector<8x64xf32>
    %92 = vector.extract_strided_slice %79 {offsets = [0, 128], sizes = [8, 64], strides = [1, 1]} : vector<8x256xf32> to vector<8x64xf32>
    %93 = math.tanh %92 : vector<8x64xf32>
    %94 = vector.extract_strided_slice %79 {offsets = [0, 192], sizes = [8, 64], strides = [1, 1]} : vector<8x256xf32> to vector<8x64xf32>
    %95 = arith.negf %94 : vector<8x64xf32>
    %96 = math.exp %95 : vector<8x64xf32>
    %cst_35 = arith.constant 1.000000e+00 : f32
    %97 = vector.broadcast %cst_35 : f32 to vector<8x64xf32>
    %98 = arith.addf %97, %96 : vector<8x64xf32>
    %99 = arith.divf %97, %98 : vector<8x64xf32>
    %100 = arith.mulf %91, %66 : vector<8x64xf32>
    %101 = arith.mulf %85, %93 : vector<8x64xf32>
    %102 = arith.addf %100, %101 : vector<8x64xf32>
    %103 = math.tanh %102 : vector<8x64xf32>
    %104 = arith.mulf %99, %103 : vector<8x64xf32>
    %105 = arith.addf %69, %104 : vector<8x64xf32>
    %c2_i32 = arith.constant 2 : i32
    %106 = arith.index_cast %c2_i32 : i32 to index
    %c0_36 = arith.constant 0 : index
    %c0_37 = arith.constant 0 : index
    %107 = vector.load %arg11[%106, %c0_36, %c0_37] : memref<8x8x256xf32, #tpu.memory_space<vmem>>, vector<1x8x256xf32>
    %108 = vector.shape_cast %107 : vector<1x8x256xf32> to vector<8x256xf32>
    %c7_i32_38 = arith.constant 7 : i32
    %109 = arith.subi %c7_i32_38, %c2_i32 : i32
    %110 = arith.index_cast %109 : i32 to index
    %c0_39 = arith.constant 0 : index
    %c0_40 = arith.constant 0 : index
    %111 = vector.load %arg11[%110, %c0_39, %c0_40] : memref<8x8x256xf32, #tpu.memory_space<vmem>>, vector<1x8x256xf32>
    %112 = vector.shape_cast %111 : vector<1x8x256xf32> to vector<8x256xf32>
    %113 = arith.select %32, %108, %112 : vector<8x256xi1>, vector<8x256xf32>
    %cst_41 = arith.constant dense<0.000000e+00> : vector<8x256xf32>
    %114 = tpu.matmul %104, %13, %cst_41 {dimension_numbers = #tpu.dot_dimension_numbers<[1], [0], [0], [1], [0, 0, 1, 1], [], []>} : vector<8x64xf32>, vector<64x256xf32>, vector<8x256xf32> -> vector<8x256xf32>
    %115 = arith.addf %113, %114 : vector<8x256xf32>
    %116 = vector.extract_strided_slice %115 {offsets = [0, 0], sizes = [8, 64], strides = [1, 1]} : vector<8x256xf32> to vector<8x64xf32>
    %117 = arith.negf %116 : vector<8x64xf32>
    %118 = math.exp %117 : vector<8x64xf32>
    %cst_42 = arith.constant 1.000000e+00 : f32
    %119 = vector.broadcast %cst_42 : f32 to vector<8x64xf32>
    %120 = arith.addf %119, %118 : vector<8x64xf32>
    %121 = arith.divf %119, %120 : vector<8x64xf32>
    %122 = vector.extract_strided_slice %115 {offsets = [0, 64], sizes = [8, 64], strides = [1, 1]} : vector<8x256xf32> to vector<8x64xf32>
    %123 = arith.negf %122 : vector<8x64xf32>
    %124 = math.exp %123 : vector<8x64xf32>
    %cst_43 = arith.constant 1.000000e+00 : f32
    %125 = vector.broadcast %cst_43 : f32 to vector<8x64xf32>
    %126 = arith.addf %125, %124 : vector<8x64xf32>
    %127 = arith.divf %125, %126 : vector<8x64xf32>
    %128 = vector.extract_strided_slice %115 {offsets = [0, 128], sizes = [8, 64], strides = [1, 1]} : vector<8x256xf32> to vector<8x64xf32>
    %129 = math.tanh %128 : vector<8x64xf32>
    %130 = vector.extract_strided_slice %115 {offsets = [0, 192], sizes = [8, 64], strides = [1, 1]} : vector<8x256xf32> to vector<8x64xf32>
    %131 = arith.negf %130 : vector<8x64xf32>
    %132 = math.exp %131 : vector<8x64xf32>
    %cst_44 = arith.constant 1.000000e+00 : f32
    %133 = vector.broadcast %cst_44 : f32 to vector<8x64xf32>
    %134 = arith.addf %133, %132 : vector<8x64xf32>
    %135 = arith.divf %133, %134 : vector<8x64xf32>
    %136 = arith.mulf %127, %102 : vector<8x64xf32>
    %137 = arith.mulf %121, %129 : vector<8x64xf32>
    %138 = arith.addf %136, %137 : vector<8x64xf32>
    %139 = math.tanh %138 : vector<8x64xf32>
    %140 = arith.mulf %135, %139 : vector<8x64xf32>
    %141 = arith.addf %105, %140 : vector<8x64xf32>
    %c3_i32 = arith.constant 3 : i32
    %142 = arith.index_cast %c3_i32 : i32 to index
    %c0_45 = arith.constant 0 : index
    %c0_46 = arith.constant 0 : index
    %143 = vector.load %arg11[%142, %c0_45, %c0_46] : memref<8x8x256xf32, #tpu.memory_space<vmem>>, vector<1x8x256xf32>
    %144 = vector.shape_cast %143 : vector<1x8x256xf32> to vector<8x256xf32>
    %c7_i32_47 = arith.constant 7 : i32
    %145 = arith.subi %c7_i32_47, %c3_i32 : i32
    %146 = arith.index_cast %145 : i32 to index
    %c0_48 = arith.constant 0 : index
    %c0_49 = arith.constant 0 : index
    %147 = vector.load %arg11[%146, %c0_48, %c0_49] : memref<8x8x256xf32, #tpu.memory_space<vmem>>, vector<1x8x256xf32>
    %148 = vector.shape_cast %147 : vector<1x8x256xf32> to vector<8x256xf32>
    %149 = arith.select %32, %144, %148 : vector<8x256xi1>, vector<8x256xf32>
    %cst_50 = arith.constant dense<0.000000e+00> : vector<8x256xf32>
    %150 = tpu.matmul %140, %13, %cst_50 {dimension_numbers = #tpu.dot_dimension_numbers<[1], [0], [0], [1], [0, 0, 1, 1], [], []>} : vector<8x64xf32>, vector<64x256xf32>, vector<8x256xf32> -> vector<8x256xf32>
    %151 = arith.addf %149, %150 : vector<8x256xf32>
    %152 = vector.extract_strided_slice %151 {offsets = [0, 0], sizes = [8, 64], strides = [1, 1]} : vector<8x256xf32> to vector<8x64xf32>
    %153 = arith.negf %152 : vector<8x64xf32>
    %154 = math.exp %153 : vector<8x64xf32>
    %cst_51 = arith.constant 1.000000e+00 : f32
    %155 = vector.broadcast %cst_51 : f32 to vector<8x64xf32>
    %156 = arith.addf %155, %154 : vector<8x64xf32>
    %157 = arith.divf %155, %156 : vector<8x64xf32>
    %158 = vector.extract_strided_slice %151 {offsets = [0, 64], sizes = [8, 64], strides = [1, 1]} : vector<8x256xf32> to vector<8x64xf32>
    %159 = arith.negf %158 : vector<8x64xf32>
    %160 = math.exp %159 : vector<8x64xf32>
    %cst_52 = arith.constant 1.000000e+00 : f32
    %161 = vector.broadcast %cst_52 : f32 to vector<8x64xf32>
    %162 = arith.addf %161, %160 : vector<8x64xf32>
    %163 = arith.divf %161, %162 : vector<8x64xf32>
    %164 = vector.extract_strided_slice %151 {offsets = [0, 128], sizes = [8, 64], strides = [1, 1]} : vector<8x256xf32> to vector<8x64xf32>
    %165 = math.tanh %164 : vector<8x64xf32>
    %166 = vector.extract_strided_slice %151 {offsets = [0, 192], sizes = [8, 64], strides = [1, 1]} : vector<8x256xf32> to vector<8x64xf32>
    %167 = arith.negf %166 : vector<8x64xf32>
    %168 = math.exp %167 : vector<8x64xf32>
    %cst_53 = arith.constant 1.000000e+00 : f32
    %169 = vector.broadcast %cst_53 : f32 to vector<8x64xf32>
    %170 = arith.addf %169, %168 : vector<8x64xf32>
    %171 = arith.divf %169, %170 : vector<8x64xf32>
    %172 = arith.mulf %163, %138 : vector<8x64xf32>
    %173 = arith.mulf %157, %165 : vector<8x64xf32>
    %174 = arith.addf %172, %173 : vector<8x64xf32>
    %175 = math.tanh %174 : vector<8x64xf32>
    %176 = arith.mulf %171, %175 : vector<8x64xf32>
    %177 = arith.addf %141, %176 : vector<8x64xf32>
    %c4_i32 = arith.constant 4 : i32
    %178 = arith.index_cast %c4_i32 : i32 to index
    %c0_54 = arith.constant 0 : index
    %c0_55 = arith.constant 0 : index
    %179 = vector.load %arg11[%178, %c0_54, %c0_55] : memref<8x8x256xf32, #tpu.memory_space<vmem>>, vector<1x8x256xf32>
    %180 = vector.shape_cast %179 : vector<1x8x256xf32> to vector<8x256xf32>
    %c7_i32_56 = arith.constant 7 : i32
    %181 = arith.subi %c7_i32_56, %c4_i32 : i32
    %182 = arith.index_cast %181 : i32 to index
    %c0_57 = arith.constant 0 : index
    %c0_58 = arith.constant 0 : index
    %183 = vector.load %arg11[%182, %c0_57, %c0_58] : memref<8x8x256xf32, #tpu.memory_space<vmem>>, vector<1x8x256xf32>
    %184 = vector.shape_cast %183 : vector<1x8x256xf32> to vector<8x256xf32>
    %185 = arith.select %32, %180, %184 : vector<8x256xi1>, vector<8x256xf32>
    %cst_59 = arith.constant dense<0.000000e+00> : vector<8x256xf32>
    %186 = tpu.matmul %176, %13, %cst_59 {dimension_numbers = #tpu.dot_dimension_numbers<[1], [0], [0], [1], [0, 0, 1, 1], [], []>} : vector<8x64xf32>, vector<64x256xf32>, vector<8x256xf32> -> vector<8x256xf32>
    %187 = arith.addf %185, %186 : vector<8x256xf32>
    %188 = vector.extract_strided_slice %187 {offsets = [0, 0], sizes = [8, 64], strides = [1, 1]} : vector<8x256xf32> to vector<8x64xf32>
    %189 = arith.negf %188 : vector<8x64xf32>
    %190 = math.exp %189 : vector<8x64xf32>
    %cst_60 = arith.constant 1.000000e+00 : f32
    %191 = vector.broadcast %cst_60 : f32 to vector<8x64xf32>
    %192 = arith.addf %191, %190 : vector<8x64xf32>
    %193 = arith.divf %191, %192 : vector<8x64xf32>
    %194 = vector.extract_strided_slice %187 {offsets = [0, 64], sizes = [8, 64], strides = [1, 1]} : vector<8x256xf32> to vector<8x64xf32>
    %195 = arith.negf %194 : vector<8x64xf32>
    %196 = math.exp %195 : vector<8x64xf32>
    %cst_61 = arith.constant 1.000000e+00 : f32
    %197 = vector.broadcast %cst_61 : f32 to vector<8x64xf32>
    %198 = arith.addf %197, %196 : vector<8x64xf32>
    %199 = arith.divf %197, %198 : vector<8x64xf32>
    %200 = vector.extract_strided_slice %187 {offsets = [0, 128], sizes = [8, 64], strides = [1, 1]} : vector<8x256xf32> to vector<8x64xf32>
    %201 = math.tanh %200 : vector<8x64xf32>
    %202 = vector.extract_strided_slice %187 {offsets = [0, 192], sizes = [8, 64], strides = [1, 1]} : vector<8x256xf32> to vector<8x64xf32>
    %203 = arith.negf %202 : vector<8x64xf32>
    %204 = math.exp %203 : vector<8x64xf32>
    %cst_62 = arith.constant 1.000000e+00 : f32
    %205 = vector.broadcast %cst_62 : f32 to vector<8x64xf32>
    %206 = arith.addf %205, %204 : vector<8x64xf32>
    %207 = arith.divf %205, %206 : vector<8x64xf32>
    %208 = arith.mulf %199, %174 : vector<8x64xf32>
    %209 = arith.mulf %193, %201 : vector<8x64xf32>
    %210 = arith.addf %208, %209 : vector<8x64xf32>
    %211 = math.tanh %210 : vector<8x64xf32>
    %212 = arith.mulf %207, %211 : vector<8x64xf32>
    %213 = arith.addf %177, %212 : vector<8x64xf32>
    %c5_i32 = arith.constant 5 : i32
    %214 = arith.index_cast %c5_i32 : i32 to index
    %c0_63 = arith.constant 0 : index
    %c0_64 = arith.constant 0 : index
    %215 = vector.load %arg11[%214, %c0_63, %c0_64] : memref<8x8x256xf32, #tpu.memory_space<vmem>>, vector<1x8x256xf32>
    %216 = vector.shape_cast %215 : vector<1x8x256xf32> to vector<8x256xf32>
    %c7_i32_65 = arith.constant 7 : i32
    %217 = arith.subi %c7_i32_65, %c5_i32 : i32
    %218 = arith.index_cast %217 : i32 to index
    %c0_66 = arith.constant 0 : index
    %c0_67 = arith.constant 0 : index
    %219 = vector.load %arg11[%218, %c0_66, %c0_67] : memref<8x8x256xf32, #tpu.memory_space<vmem>>, vector<1x8x256xf32>
    %220 = vector.shape_cast %219 : vector<1x8x256xf32> to vector<8x256xf32>
    %221 = arith.select %32, %216, %220 : vector<8x256xi1>, vector<8x256xf32>
    %cst_68 = arith.constant dense<0.000000e+00> : vector<8x256xf32>
    %222 = tpu.matmul %212, %13, %cst_68 {dimension_numbers = #tpu.dot_dimension_numbers<[1], [0], [0], [1], [0, 0, 1, 1], [], []>} : vector<8x64xf32>, vector<64x256xf32>, vector<8x256xf32> -> vector<8x256xf32>
    %223 = arith.addf %221, %222 : vector<8x256xf32>
    %224 = vector.extract_strided_slice %223 {offsets = [0, 0], sizes = [8, 64], strides = [1, 1]} : vector<8x256xf32> to vector<8x64xf32>
    %225 = arith.negf %224 : vector<8x64xf32>
    %226 = math.exp %225 : vector<8x64xf32>
    %cst_69 = arith.constant 1.000000e+00 : f32
    %227 = vector.broadcast %cst_69 : f32 to vector<8x64xf32>
    %228 = arith.addf %227, %226 : vector<8x64xf32>
    %229 = arith.divf %227, %228 : vector<8x64xf32>
    %230 = vector.extract_strided_slice %223 {offsets = [0, 64], sizes = [8, 64], strides = [1, 1]} : vector<8x256xf32> to vector<8x64xf32>
    %231 = arith.negf %230 : vector<8x64xf32>
    %232 = math.exp %231 : vector<8x64xf32>
    %cst_70 = arith.constant 1.000000e+00 : f32
    %233 = vector.broadcast %cst_70 : f32 to vector<8x64xf32>
    %234 = arith.addf %233, %232 : vector<8x64xf32>
    %235 = arith.divf %233, %234 : vector<8x64xf32>
    %236 = vector.extract_strided_slice %223 {offsets = [0, 128], sizes = [8, 64], strides = [1, 1]} : vector<8x256xf32> to vector<8x64xf32>
    %237 = math.tanh %236 : vector<8x64xf32>
    %238 = vector.extract_strided_slice %223 {offsets = [0, 192], sizes = [8, 64], strides = [1, 1]} : vector<8x256xf32> to vector<8x64xf32>
    %239 = arith.negf %238 : vector<8x64xf32>
    %240 = math.exp %239 : vector<8x64xf32>
    %cst_71 = arith.constant 1.000000e+00 : f32
    %241 = vector.broadcast %cst_71 : f32 to vector<8x64xf32>
    %242 = arith.addf %241, %240 : vector<8x64xf32>
    %243 = arith.divf %241, %242 : vector<8x64xf32>
    %244 = arith.mulf %235, %210 : vector<8x64xf32>
    %245 = arith.mulf %229, %237 : vector<8x64xf32>
    %246 = arith.addf %244, %245 : vector<8x64xf32>
    %247 = math.tanh %246 : vector<8x64xf32>
    %248 = arith.mulf %243, %247 : vector<8x64xf32>
    %249 = arith.addf %213, %248 : vector<8x64xf32>
    %c6_i32 = arith.constant 6 : i32
    %250 = arith.index_cast %c6_i32 : i32 to index
    %c0_72 = arith.constant 0 : index
    %c0_73 = arith.constant 0 : index
    %251 = vector.load %arg11[%250, %c0_72, %c0_73] : memref<8x8x256xf32, #tpu.memory_space<vmem>>, vector<1x8x256xf32>
    %252 = vector.shape_cast %251 : vector<1x8x256xf32> to vector<8x256xf32>
    %c7_i32_74 = arith.constant 7 : i32
    %253 = arith.subi %c7_i32_74, %c6_i32 : i32
    %254 = arith.index_cast %253 : i32 to index
    %c0_75 = arith.constant 0 : index
    %c0_76 = arith.constant 0 : index
    %255 = vector.load %arg11[%254, %c0_75, %c0_76] : memref<8x8x256xf32, #tpu.memory_space<vmem>>, vector<1x8x256xf32>
    %256 = vector.shape_cast %255 : vector<1x8x256xf32> to vector<8x256xf32>
    %257 = arith.select %32, %252, %256 : vector<8x256xi1>, vector<8x256xf32>
    %cst_77 = arith.constant dense<0.000000e+00> : vector<8x256xf32>
    %258 = tpu.matmul %248, %13, %cst_77 {dimension_numbers = #tpu.dot_dimension_numbers<[1], [0], [0], [1], [0, 0, 1, 1], [], []>} : vector<8x64xf32>, vector<64x256xf32>, vector<8x256xf32> -> vector<8x256xf32>
    %259 = arith.addf %257, %258 : vector<8x256xf32>
    %260 = vector.extract_strided_slice %259 {offsets = [0, 0], sizes = [8, 64], strides = [1, 1]} : vector<8x256xf32> to vector<8x64xf32>
    %261 = arith.negf %260 : vector<8x64xf32>
    %262 = math.exp %261 : vector<8x64xf32>
    %cst_78 = arith.constant 1.000000e+00 : f32
    %263 = vector.broadcast %cst_78 : f32 to vector<8x64xf32>
    %264 = arith.addf %263, %262 : vector<8x64xf32>
    %265 = arith.divf %263, %264 : vector<8x64xf32>
    %266 = vector.extract_strided_slice %259 {offsets = [0, 64], sizes = [8, 64], strides = [1, 1]} : vector<8x256xf32> to vector<8x64xf32>
    %267 = arith.negf %266 : vector<8x64xf32>
    %268 = math.exp %267 : vector<8x64xf32>
    %cst_79 = arith.constant 1.000000e+00 : f32
    %269 = vector.broadcast %cst_79 : f32 to vector<8x64xf32>
    %270 = arith.addf %269, %268 : vector<8x64xf32>
    %271 = arith.divf %269, %270 : vector<8x64xf32>
    %272 = vector.extract_strided_slice %259 {offsets = [0, 128], sizes = [8, 64], strides = [1, 1]} : vector<8x256xf32> to vector<8x64xf32>
    %273 = math.tanh %272 : vector<8x64xf32>
    %274 = vector.extract_strided_slice %259 {offsets = [0, 192], sizes = [8, 64], strides = [1, 1]} : vector<8x256xf32> to vector<8x64xf32>
    %275 = arith.negf %274 : vector<8x64xf32>
    %276 = math.exp %275 : vector<8x64xf32>
    %cst_80 = arith.constant 1.000000e+00 : f32
    %277 = vector.broadcast %cst_80 : f32 to vector<8x64xf32>
    %278 = arith.addf %277, %276 : vector<8x64xf32>
    %279 = arith.divf %277, %278 : vector<8x64xf32>
    %280 = arith.mulf %271, %246 : vector<8x64xf32>
    %281 = arith.mulf %265, %273 : vector<8x64xf32>
    %282 = arith.addf %280, %281 : vector<8x64xf32>
    %283 = math.tanh %282 : vector<8x64xf32>
    %284 = arith.mulf %279, %283 : vector<8x64xf32>
    %285 = arith.addf %249, %284 : vector<8x64xf32>
    %c7_i32_81 = arith.constant 7 : i32
    %286 = arith.index_cast %c7_i32_81 : i32 to index
    %c0_82 = arith.constant 0 : index
    %c0_83 = arith.constant 0 : index
    %287 = vector.load %arg11[%286, %c0_82, %c0_83] : memref<8x8x256xf32, #tpu.memory_space<vmem>>, vector<1x8x256xf32>
    %288 = vector.shape_cast %287 : vector<1x8x256xf32> to vector<8x256xf32>
    %c7_i32_84 = arith.constant 7 : i32
    %289 = arith.subi %c7_i32_84, %c7_i32_81 : i32
    %290 = arith.index_cast %289 : i32 to index
    %c0_85 = arith.constant 0 : index
    %c0_86 = arith.constant 0 : index
    %291 = vector.load %arg11[%290, %c0_85, %c0_86] : memref<8x8x256xf32, #tpu.memory_space<vmem>>, vector<1x8x256xf32>
    %292 = vector.shape_cast %291 : vector<1x8x256xf32> to vector<8x256xf32>
    %293 = arith.select %32, %288, %292 : vector<8x256xi1>, vector<8x256xf32>
    %cst_87 = arith.constant dense<0.000000e+00> : vector<8x256xf32>
    %294 = tpu.matmul %284, %13, %cst_87 {dimension_numbers = #tpu.dot_dimension_numbers<[1], [0], [0], [1], [0, 0, 1, 1], [], []>} : vector<8x64xf32>, vector<64x256xf32>, vector<8x256xf32> -> vector<8x256xf32>
    %295 = arith.addf %293, %294 : vector<8x256xf32>
    %296 = vector.extract_strided_slice %295 {offsets = [0, 0], sizes = [8, 64], strides = [1, 1]} : vector<8x256xf32> to vector<8x64xf32>
    %297 = arith.negf %296 : vector<8x64xf32>
    %298 = math.exp %297 : vector<8x64xf32>
    %cst_88 = arith.constant 1.000000e+00 : f32
    %299 = vector.broadcast %cst_88 : f32 to vector<8x64xf32>
    %300 = arith.addf %299, %298 : vector<8x64xf32>
    %301 = arith.divf %299, %300 : vector<8x64xf32>
    %302 = vector.extract_strided_slice %295 {offsets = [0, 64], sizes = [8, 64], strides = [1, 1]} : vector<8x256xf32> to vector<8x64xf32>
    %303 = arith.negf %302 : vector<8x64xf32>
    %304 = math.exp %303 : vector<8x64xf32>
    %cst_89 = arith.constant 1.000000e+00 : f32
    %305 = vector.broadcast %cst_89 : f32 to vector<8x64xf32>
    %306 = arith.addf %305, %304 : vector<8x64xf32>
    %307 = arith.divf %305, %306 : vector<8x64xf32>
    %308 = vector.extract_strided_slice %295 {offsets = [0, 128], sizes = [8, 64], strides = [1, 1]} : vector<8x256xf32> to vector<8x64xf32>
    %309 = math.tanh %308 : vector<8x64xf32>
    %310 = vector.extract_strided_slice %295 {offsets = [0, 192], sizes = [8, 64], strides = [1, 1]} : vector<8x256xf32> to vector<8x64xf32>
    %311 = arith.negf %310 : vector<8x64xf32>
    %312 = math.exp %311 : vector<8x64xf32>
    %cst_90 = arith.constant 1.000000e+00 : f32
    %313 = vector.broadcast %cst_90 : f32 to vector<8x64xf32>
    %314 = arith.addf %313, %312 : vector<8x64xf32>
    %315 = arith.divf %313, %314 : vector<8x64xf32>
    %316 = arith.mulf %307, %282 : vector<8x64xf32>
    %317 = arith.mulf %301, %309 : vector<8x64xf32>
    %318 = arith.addf %316, %317 : vector<8x64xf32>
    %319 = math.tanh %318 : vector<8x64xf32>
    %320 = arith.mulf %315, %319 : vector<8x64xf32>
    %321 = arith.addf %285, %320 : vector<8x64xf32>
    %c8_i32 = arith.constant 8 : i32
    %cst_91 = arith.constant 1.250000e-01 : f32
    %322 = vector.broadcast %cst_91 : f32 to vector<8x64xf32>
    %323 = arith.mulf %321, %322 : vector<8x64xf32>
    %c0_92 = arith.constant 0 : index
    %c0_93 = arith.constant 0 : index
    %324 = vector.load %arg6[%c0_92, %c0_93] : memref<64x16xf32, #tpu.memory_space<vmem>>, vector<64x16xf32>
    %cst_94 = arith.constant dense<0.000000e+00> : vector<8x16xf32>
    %325 = tpu.matmul %323, %324, %cst_94 {dimension_numbers = #tpu.dot_dimension_numbers<[1], [0], [0], [1], [0, 0, 1, 1], [], []>} : vector<8x64xf32>, vector<64x16xf32>, vector<8x16xf32> -> vector<8x16xf32>
    %c0_95 = arith.constant 0 : index
    %c0_96 = arith.constant 0 : index
    %326 = vector.load %arg7[%c0_95, %c0_96] : memref<1x16xf32, #tpu.memory_space<vmem>>, vector<1x16xf32>
    %327 = vector.broadcast %326 : vector<1x16xf32> to vector<8x16xf32>
    %328 = arith.addf %325, %327 : vector<8x16xf32>
    %329 = math.tanh %328 : vector<8x16xf32>
    %c0_97 = arith.constant 0 : index
    %c0_98 = arith.constant 0 : index
    %330 = vector.load %arg8[%c0_97, %c0_98] : memref<16x2xf32, #tpu.memory_space<vmem>>, vector<16x2xf32>
    %cst_99 = arith.constant dense<0.000000e+00> : vector<8x2xf32>
    %331 = tpu.matmul %329, %330, %cst_99 {dimension_numbers = #tpu.dot_dimension_numbers<[1], [0], [0], [1], [0, 0, 1, 1], [], []>} : vector<8x16xf32>, vector<16x2xf32>, vector<8x2xf32> -> vector<8x2xf32>
    %c0_100 = arith.constant 0 : index
    %c0_101 = arith.constant 0 : index
    %332 = vector.load %arg9[%c0_100, %c0_101] : memref<1x2xf32, #tpu.memory_space<vmem>>, vector<1x2xf32>
    %333 = vector.broadcast %332 : vector<1x2xf32> to vector<8x2xf32>
    %334 = arith.addf %331, %333 : vector<8x2xf32>
    %c0_102 = arith.constant 0 : index
    %c0_103 = arith.constant 0 : index
    %335 = vector.load %arg10[%c0_102, %c0_103] : memref<8x2xf32, #tpu.memory_space<vmem>>, vector<8x2xf32>
    tpu.vector_store %arg10[%c0_102, %c0_103], %334 {strides = array<i32>} : memref<8x2xf32, #tpu.memory_space<vmem>>, vector<8x2xf32>,
    return
  }
  func.func @transform_0(%arg0: i32) -> (i32, i32, i32) {
    %c0_i32 = arith.constant 0 : i32
    %c0_i32_0 = arith.constant 0 : i32
    %c0_i32_1 = arith.constant 0 : i32
    return %c0_i32, %arg0, %c0_i32_0 : i32, i32, i32
  }
  func.func @transform_1(%arg0: i32) -> (i32, i32) {
    %c0_i32 = arith.constant 0 : i32
    %c0_i32_0 = arith.constant 0 : i32
    %c0_i32_1 = arith.constant 0 : i32
    return %c0_i32, %c0_i32_0 : i32, i32
  }
  func.func @transform_2(%arg0: i32) -> (i32, i32) {
    %c0_i32 = arith.constant 0 : i32
    %c0_i32_0 = arith.constant 0 : i32
    %c0_i32_1 = arith.constant 0 : i32
    return %c0_i32, %c0_i32_0 : i32, i32
  }
  func.func @transform_3(%arg0: i32) -> (i32, i32) {
    %c0_i32 = arith.constant 0 : i32
    %c0_i32_0 = arith.constant 0 : i32
    %c0_i32_1 = arith.constant 0 : i32
    return %c0_i32, %c0_i32_0 : i32, i32
  }
  func.func @transform_4(%arg0: i32) -> (i32, i32) {
    %c0_i32 = arith.constant 0 : i32
    %c0_i32_0 = arith.constant 0 : i32
    %c0_i32_1 = arith.constant 0 : i32
    return %c0_i32, %c0_i32_0 : i32, i32
  }
  func.func @transform_5(%arg0: i32) -> (i32, i32) {
    %c0_i32 = arith.constant 0 : i32
    %c0_i32_0 = arith.constant 0 : i32
    %c0_i32_1 = arith.constant 0 : i32
    return %c0_i32, %c0_i32_0 : i32, i32
  }
  func.func @transform_6(%arg0: i32) -> (i32, i32) {
    %c0_i32 = arith.constant 0 : i32
    %c0_i32_0 = arith.constant 0 : i32
    %c0_i32_1 = arith.constant 0 : i32
    return %c0_i32, %c0_i32_0 : i32, i32
  }
  func.func @transform_7(%arg0: i32) -> (i32, i32) {
    %c0_i32 = arith.constant 0 : i32
    %c0_i32_0 = arith.constant 0 : i32
    %c0_i32_1 = arith.constant 0 : i32
    return %c0_i32, %c0_i32_0 : i32, i32
  }
  func.func @transform_8(%arg0: i32) -> (i32, i32) {
    %c0_i32 = arith.constant 0 : i32
    %c0_i32_0 = arith.constant 0 : i32
    %c0_i32_1 = arith.constant 0 : i32
    return %c0_i32, %c0_i32_0 : i32, i32
  }
  func.func @transform_9(%arg0: i32) -> (i32, i32) {
    %c0_i32 = arith.constant 0 : i32
    %c0_i32_0 = arith.constant 0 : i32
    return %arg0, %c0_i32 : i32, i32
  }
}

</mosaic_0001>

<bundles_post_ra>
// kernel: tpu_custom_call.1
= control target key start
LH: loop header
LB: loop body
LE: loop exit
PB: predicated region body
PF: predicated region fallthrough
CT: control target
= control target key end

     0   :  { %14 = vsyncpa [#allocation4], 0  ;;  %s2194_s0 = inlined_call_operand.vmem [shape: f32[8,8,32], index: 0, kind: input, shape index: {}]   ;;  %s2195_s1 = inlined_call_operand.vmem [shape: f32[1,32], index: 1, kind: input, shape index: {}]   ;;  %s2196_s2 = inlined_call_operand.hbm [shape: f32[32,256], index: 2, kind: input, shape index: {}]   ;;  %s2197_s3 = inlined_call_operand.hbm [shape: f32[64,256], index: 3, kind: input, shape index: {}]   ;;  %s2198_s4 = inlined_call_operand.vmem [shape: f32[1,256], index: 4, kind: input, shape index: {}]   ;;  %s2199_s5 = inlined_call_operand.vmem [shape: f32[64,16], index: 5, kind: input, shape index: {}]   ;;  %s2200_s6 = inlined_call_operand.vmem [shape: f32[1,16], index: 6, kind: input, shape index: {}]   ;;  %s2201_s7 = inlined_call_operand.vmem [shape: f32[16,2], index: 7, kind: input, shape index: {}]   ;;  %s2202_s8 = inlined_call_operand.vmem [shape: f32[1,2], index: 8, kind: input, shape index: {}]   ;;  %s2203_s9 = inlined_call_operand.vmem [shape: f32[8,2], index: 9, kind: output, shape index: {}]  }
   0x1   :  { %15 = vsyncpa [#allocation6], 0  ;;  %s1734_s30 = smov [#allocation3]   ;;  %s1686_s13 = scalar_lea.hbm %s2196_s2, 1024 }
   0x2   :  { %s25_s10 = sshll.u32 %s1734_s30, 4  ;;  %p1687_p0 = scmp.ne.s32.totalorder %s2196_s2, %s1686_s13  ;;  %s26_s10 = int_to_ptr.vmem [resolvable:$true] %s25_s10 }
   0x3   :  { %p1690_p1 = scmp.lt.u32.totalorder %s1686_s13, %s2196_s2 }
   0x5   :  { %p1692_p2 = pnand %p1690_p1, %p1687_p0 }
   0x7   :  { %1695 = shalt.err (!%p1692_p2)
}
   0x8   :  { %s1696_s18 = scalar_lea.vmem %s26_s10, 1024  ;;  %p1701_p4 = scmp.lt.s32.totalorder %s26_s10, %s26_s10 }
   0x9   :  { %p1697_p3 = scmp.ne.s32.totalorder %s26_s10, %s1696_s18  ;;  %p1702_p5 = scmp.lt.s32.totalorder %s1696_s18, %s1696_s18 }
   0xb   :  { %p1703_p6 = por %p1702_p5, %p1701_p4 }
   0xd   :  { %p1704_p7 = pnand %p1703_p6, %p1697_p3 }
   0xf   :  { %1707 = shalt.err (!%p1704_p7)
}
  0x10   :  { %s1735_s19 = smov 256   ;;  %s1736_s20 = smov 16  }
  0x11   :  { %31 = dma.hbm_to_vmem [thread:$0]  %s2196_s2, 1024, %s26_s10, [#allocation4], %s1735_s19, %s1735_s19, %s1736_s20  }
  0x12   :  { %s1737_s23 = smov [#allocation5]   ;;  %s1708_s27 = scalar_lea.hbm %s2197_s3, 2048 }
  0x13   :  { %s37_s24 = sshll.u32 %s1737_s23, 4  ;;  %p1709_p8 = scmp.ne.s32.totalorder %s2197_s3, %s1708_s27  ;;  %s38_s24 = int_to_ptr.vmem [resolvable:$true] %s37_s24 }
  0x14   :  { %p1712_p9 = scmp.lt.u32.totalorder %s1708_s27, %s2197_s3 }
  0x16   :  { %p1714_p10 = pnand %p1712_p9, %p1709_p8 }
  0x18   :  { %1717 = shalt.err (!%p1714_p10)
}
  0x19   :  { %s1718_s12 = scalar_lea.vmem %s38_s24, 2048  ;;  %p1723_p12 = scmp.lt.s32.totalorder %s38_s24, %s38_s24 }
  0x1a   :  { %p1719_p11 = scmp.ne.s32.totalorder %s38_s24, %s1718_s12  ;;  %p1724_p13 = scmp.lt.s32.totalorder %s1718_s12, %s1718_s12 }
  0x1c   :  { %p1725_p0 = por %p1724_p13, %p1723_p12 }
  0x1e   :  { %p1726_p1 = pnand %p1725_p0, %p1719_p11 }
  0x20   :  { %1729 = shalt.err (!%p1726_p1)
}
  0x21   :  { %43 = dma.hbm_to_vmem [thread:$0]  %s2197_s3, 2048, %s38_s24, [#allocation6], %s1735_s19, %s1735_s19, %s1736_s20  }
  0x22   :  { %1730 = dma.done.wait [#allocation4], 1024  }
  0x23   :  { %1731 = vsyncadd [#allocation4], 4294966272 }
  0x24   :  { %1732 = dma.done.wait [#allocation6], 2048  }
  0x25   :  { %1733 = vsyncadd [#allocation6], 4294965248  ;;  %v1738_v0 = vmov 0.0   ;;  %v92_v1 = vld [vmem:[#allocation3 + $0x8] sm:$0xff]  ;;  %v94_v2 = vld [vmem:[#allocation3 + $0x18] sm:$0xff]  ;;  %vm111_vm0 = vcmask 261120   ;;  %v101_v62 = vlaneseq }
  0x26   :  { %200 = vmatprep.mubr.f32.mxu0 %v1738_v0  ;;  %385 = vmatprep.mubr.f32.mxu1 %v1738_v0  ;;  %v91_v3 = vld [vmem:[#allocation3] sm:$0xff]  ;;  %v1413_v4 = vpack.c.bf16 %v94_v2, %v92_v1  ;;  %v93_v5 = vld [vmem:[#allocation3 + $0x10] sm:$0xff]  ;;  %v96_v6 = vld [vmem:[#allocation3 + $0x28] sm:$0xff]  ;;  %vm317_vm3 = vcmask 523264   ;;  %vm1741_vm4 = vmmov 0   ;;  %vm1257_vm5 = vcmask 130048  }
  0x27   :  { %v98_v7 = vld [vmem:[#allocation3 + $0x38] sm:$0xff]  ;;  %v1415_v8 = vpack.c.bf16 %v93_v5, %v91_v3  ;;  %v95_v10 = vld [vmem:[#allocation3 + $0x20] sm:$0xff]  ;;  %v97_v11 = vld [vmem:[#allocation3 + $0x30] sm:$0xff]  ;;  %v102_v63 = vshrl.u32 %v101_v62, 7  ;;  %vm1331_vm6 = vcmask 15360  }
  0x28   :  { %v1417_v9 = vpack.c.bf16 %v98_v7, %v96_v6  ;;  %v60_v12 = vld [vmem:[%s2194_s0] sm:$0xff]  ;;  %1414 = vmatprep.subr.bf16.mxu0 %v1413_v4  ;;  %v61_v14 = vld [vmem:[%s2194_s0 + $0x8] sm:$0xff]  ;;  %v1419_v15 = vpack.c.bf16 %v97_v11, %v95_v10  ;;  %v268_v19 = vld [vmem:[#allocation5 + $0x18] sm:$0xff]  ;;  %v282_v11 = vand.u32 127, %v101_v62 }
  0x29   :  { %v1824_v13 = vld [vmem:[%s2195_s1] ss:$0 sm:$0xff]  ;;  %1416 = vmatpush1.bf16.msra.mxu0 %v1415_v8  ;;  %v266_v18 = vld [vmem:[#allocation5 + $0x8] sm:$0xff]  ;;  %v62_v20 = vld [vmem:[%s2194_s0 + $0x10] sm:$0xff]  ;;  %v103_v1 = vsub.s32 0, %v102_v63  ;;  %v107_v4 = vsub.s32 1, %v102_v63 }
  0x2a   :  { %v75_v16 = vadd.f32 %v1824_v13, %v60_v12  ;;  %v76_v17 = vadd.f32 %v1824_v13, %v61_v14  ;;  %1418 = vmatprep.subr.bf16.mxu0 %v1417_v9  ;;  %v1834_v21 = vpack.c.bf16 %v268_v19, %v266_v18  ;;  %v265_v22 = vld [vmem:[#allocation5] sm:$0xff]  ;;  %v267_v23 = vld [vmem:[#allocation5 + $0x10] sm:$0xff]  ;;  %v270_v25 = vld [vmem:[#allocation5 + $0x28] sm:$0xff]  ;;  %v77_v31 = vadd.f32 %v1824_v13, %v62_v20 }
  0x2b   :  { %v1836_v24 = vpack.c.bf16 %v267_v23, %v265_v22  ;;  %v272_v26 = vld [vmem:[#allocation5 + $0x38] sm:$0xff]  ;;  %v269_v27 = vld [vmem:[#allocation5 + $0x20] sm:$0xff]  ;;  %v271_v29 = vld [vmem:[#allocation5 + $0x30] sm:$0xff]  ;;  %v283_v18 = vadd.s32 128, %v282_v11  ;;  %v288_v22 = vand.u32 63, %v282_v11 }
  0x2c   :  { %1572 = vtanh.f32 %v75_v16  ;;  %1422 = vmatprep.subr.bf16.mxu1 %v1834_v21  ;;  %v1839_v28 = vpack.c.bf16 %v272_v26, %v270_v25  ;;  %v274_v30 = vld [vmem:[#allocation5 + $0x48] sm:$0xff]  ;;  %v1843_v32 = vpack.c.bf16 %v271_v29, %v269_v27  ;;  %v276_v33 = vld [vmem:[#allocation5 + $0x58] sm:$0xff]  ;;  %v273_v36 = vld [vmem:[#allocation5 + $0x40] sm:$0xff] }
  0x2d   :  { %1420 = vmatpush1.bf16.msra.mxu0 %v1419_v15  ;;  %1574 = vtanh.f32 %v76_v17  ;;  %1424 = vmatpush1.bf16.msra.mxu1 %v1836_v24  ;;  %v63_v34 = vld [vmem:[%s2194_s0 + $0x18] sm:$0xff]  ;;  %v1849_v35 = vpack.c.bf16 %v276_v33, %v274_v30  ;;  %v275_v37 = vld [vmem:[#allocation5 + $0x50] sm:$0xff]  ;;  %v278_v38 = vld [vmem:[#allocation5 + $0x68] sm:$0xff]  ;;  %v295_v26 = vand.u32 63, %v283_v18  ;;  %vm1930_vm1 = vcmp.lt.s32.totalorder %v288_v22, 32 }
  0x2e   :  { %1426 = vmatprep.subr.bf16.mxu1 %v1839_v28  ;;  %1454 = vmatprep.subr.bf16.mxu0 %v1834_v21  ;;  %v280_v39 = vld [vmem:[#allocation5 + $0x78] sm:$0xff]  ;;  %1576 = vtanh.f32 %v77_v31  ;;  %v78_v40 = vadd.f32 %v1824_v13, %v63_v34  ;;  %v1854_v41 = vpack.c.bf16 %v275_v37, %v273_v36  ;;  %v64_v42 = vld [vmem:[%s2194_s0 + $0x20] sm:$0xff]  ;;  %v279_v45 = vld [vmem:[#allocation5 + $0x70] sm:$0xff] }
  0x2f   :  { %v1860_v43 = vpack.c.bf16 %v280_v39, %v278_v38  ;;  %v277_v44 = vld [vmem:[#allocation5 + $0x60] sm:$0xff]  ;;  %v79_v47 = vadd.f32 %v1824_v13, %v64_v42  ;;  %v65_v49 = vld [vmem:[%s2194_s0 + $0x28] sm:$0xff]  ;;  %v66_v52 = vld [vmem:[%s2194_s0 + $0x30] sm:$0xff]  ;;  %vm1936_vm2 = vcmp.lt.s32.totalorder %v295_v26, 32 }
  0x30   :  { %1578 = vtanh.f32 %v78_v40  ;;  %v1864_v48 = vpack.c.bf16 %v279_v45, %v277_v44  ;;  %v80_v51 = vadd.f32 %v1824_v13, %v65_v49  ;;  %v81_v54 = vadd.f32 %v1824_v13, %v66_v52  ;;  %v67_v55 = vld [vmem:[%s2194_s0 + $0x38] sm:$0xff]  ;;  %v99_v2 = vld [vmem:[%s2198_s4] sm:$0x3]  ;;  %s1739_s4 = smov 64   ;;  %v1158_v34 = vld [vmem:[%s2199_s5 + $0x8] sm:$0xff] }
  0x31   :  { %1428 = vmatpush1.bf16.msra.mxu1 %v1843_v32  ;;  %1580 = vtanh.f32 %v79_v47  ;;  %v82_v57 = vadd.f32 %v1824_v13, %v67_v55  ;;  %v104_v6 = vrot.slane %v99_v2, %v103_v1  ;;  %v108_v7 = vrot.slane %v99_v2, %v107_v4 }
  0x32   :  { %1430 = vmatprep.subr.bf16.mxu1 %v1849_v35  ;;  %1582 = vtanh.f32 %v80_v51 }
  0x33   :  { %1584 = vtanh.f32 %v81_v54 }
  0x34   :  { %1586 = vtanh.f32 %v82_v57 }
  0x35   :  { %1432 = vmatpush1.bf16.msra.mxu1 %v1854_v41 }
  0x36   :  { %v1573_v46 = vpop.eup %1572  ;;  %1434 = vmatprep.subr.bf16.mxu1 %v1860_v43 }
  0x37   :  { %1340 = vmatmul.mubr.msk.f32.vlgmr.msra.gmra.mrb[0].mxu0 %vm111_vm0, %v1573_v46  ;;  %v1575_v50 = vpop.eup %1574 }
  0x38   :  { %206 = vmatprep.mubr.f32.mxu0 %v1738_v0  ;;  %1456 = vmatpush1.bf16.msra.mxu0 %v1836_v24  ;;  %v1577_v53 = vpop.eup %1576 }
  0x39   :  { %1458 = vmatprep.subr.bf16.mxu0 %v1839_v28  ;;  %1436 = vmatpush1.bf16.msra.mxu1 %v1864_v48 }
  0x3a   :  { %1438 = vmatprep.subr.bf16.mxu1 %v1834_v21  ;;  %v1579_v56 = vpop.eup %1578 }
  0x3b   :  { %1341 = vmatmul.mubr.msk.f32.gmra.mrb[2].mxu0 %vm111_vm0, %v1575_v50  ;;  %v1581_v58 = vpop.eup %1580 }
  0x3c   :  { %212 = vmatprep.mubr.f32.mxu0 %v1738_v0  ;;  %1460 = vmatpush1.bf16.msra.mxu0 %v1843_v32  ;;  %v1583_v59 = vpop.eup %1582 }
  0x3d   :  { %386 = vmatmul.mubr.f32.vlgmr.msra.gmra.mrb[0].mxu1 %v1738_v0  ;;  %1462 = vmatprep.subr.bf16.mxu0 %v1849_v35  ;;  %v1585_v60 = vpop.eup %1584 }
  0x3e   :  { %1440 = vmatpush1.bf16.msra.mxu1 %v1836_v24  ;;  %494 = vmatprep.mubr.f32.mxu1 %v1738_v0  ;;  %v1587_v61 = vpop.eup %1586 }
  0x3f   :  { %1342 = vmatmul.mubr.msk.f32.gmra.mrb[4].mxu0 %vm111_vm0, %v1577_v53  ;;  %1442 = vmatprep.subr.bf16.mxu1 %v1839_v28 }
  0x40   :  { %218 = vmatprep.mubr.f32.mxu0 %v1738_v0  ;;  %1464 = vmatpush1.bf16.msra.mxu0 %v1854_v41 }
  0x41   :  { %1466 = vmatprep.subr.bf16.mxu0 %v1860_v43 }
  0x42   :  { %1444 = vmatpush1.bf16.msra.mxu1 %v1843_v32 }
  0x43   :  { %1343 = vmatmul.mubr.msk.f32.gmra.mrb[6].mxu0 %vm111_vm0, %v1579_v56  ;;  %1446 = vmatprep.subr.bf16.mxu1 %v1849_v35 }
  0x44   :  { %224 = vmatprep.mubr.f32.mxu0 %v1738_v0  ;;  %1468 = vmatpush1.bf16.msra.mxu0 %v1864_v48 }
  0x45   :  { %1486 = vmatprep.subr.bf16.mxu0 %v1834_v21 }
  0x46   :  { %1448 = vmatpush1.bf16.msra.mxu1 %v1854_v41 }
  0x47   :  { %1344 = vmatmul.mubr.msk.f32.gmra.mrb[8].mxu0 %vm111_vm0, %v1581_v58  ;;  %1450 = vmatprep.subr.bf16.mxu1 %v1860_v43 }
  0x48   :  { %230 = vmatprep.mubr.f32.mxu0 %v1738_v0 }
  0x4a   :  { %1452 = vmatpush1.bf16.msra.mxu1 %v1864_v48 }
  0x4b   :  { %1345 = vmatmul.mubr.msk.f32.gmra.mrb[10].mxu0 %vm111_vm0, %v1583_v59  ;;  %1470 = vmatprep.subr.bf16.mxu1 %v1834_v21 }
  0x4c   :  { %236 = vmatprep.mubr.f32.mxu0 %v1738_v0 }
  0x4f   :  { %1346 = vmatmul.mubr.msk.f32.gmra.mrb[12].mxu0 %vm111_vm0, %v1585_v60 }
  0x50   :  { %242 = vmatprep.mubr.f32.mxu0 %v1738_v0 }
  0x53   :  { %1347 = vmatmul.mubr.msk.f32.gmra.mrb[14].mxu0 %vm111_vm0, %v1587_v61 }
  0x54   :  { %603 = vmatprep.mubr.f32.mxu0 %v1738_v0 }
 0x10a   :  { %v202_v3 = vpop.f32.mrb[0].mxu0 }
 0x10b   :  { %v204_v5 = vpop.f32.mrb[1].mxu0  ;;  %v1998_v61 = vadd.f32 %v202_v3, %v104_v6 }
 0x10c   :  { %v2002_v1 = vadd.f32 %v204_v5, %v108_v7 }
 0x10e   :  { %v208_v8 = vpop.f32.mrb[2].mxu0 }
 0x10f   :  { %v1918_v9 = vadd.f32 %v208_v8, %v104_v6  ;;  %v210_v10 = vpop.f32.mrb[3].mxu0 }
 0x110   :  { %v1920_v12 = vadd.f32 %v210_v10, %v108_v7  ;;  %v387_v13 = vpop.f32.mrb[0].mxu1 }
 0x111   :  { %v389_v14 = vpop.f32.mrb[1].mxu1 }
 0x112   :  { %v214_v15 = vpop.f32.mrb[4].mxu0 }
 0x113   :  { %v1922_v16 = vadd.f32 %v214_v15, %v104_v6  ;;  %v216_v17 = vpop.f32.mrb[5].mxu0 }
 0x114   :  { %v1924_v19 = vadd.f32 %v216_v17, %v108_v7 }
 0x116   :  { %v220_v20 = vpop.f32.mrb[6].mxu0 }
 0x117   :  { %v1926_v23 = vadd.f32 %v220_v20, %v104_v6  ;;  %v222_v25 = vpop.f32.mrb[7].mxu0 }
 0x118   :  { %v1928_v27 = vadd.f32 %v222_v25, %v108_v7 }
 0x11a   :  { %v226_v29 = vpop.f32.mrb[8].mxu0 }
 0x11b   :  { %v1934_v31 = vadd.f32 %v226_v29, %v104_v6  ;;  %v228_v33 = vpop.f32.mrb[9].mxu0 }
 0x11c   :  { %v1940_v36 = vadd.f32 %v228_v33, %v108_v7 }
 0x11d   :  { %v641_v37 = vsel %vm1930_vm1, %v1926_v23, %v1934_v31  ;;  %v744_v38 = vsel %vm1930_vm1, %v1934_v31, %v1926_v23 }
 0x11e   :  { %v232_v39 = vpop.f32.mrb[10].mxu0  ;;  %v642_v40 = vsel %vm1936_vm2, %v1928_v27, %v1940_v36  ;;  %v745_v42 = vsel %vm1936_vm2, %v1940_v36, %v1928_v27 }
 0x11f   :  { %v1958_v44 = vadd.f32 %v232_v39, %v104_v6  ;;  %v234_v45 = vpop.f32.mrb[11].mxu0 }
 0x120   :  { %v1960_v46 = vadd.f32 %v234_v45, %v108_v7 }
 0x121   :  { %v532_v47 = vsel %vm1930_vm1, %v1922_v16, %v1958_v44  ;;  %v847_v49 = vsel %vm1930_vm1, %v1958_v44, %v1922_v16 }
 0x122   :  { %v238_v50 = vpop.f32.mrb[12].mxu0  ;;  %v533_v51 = vsel %vm1936_vm2, %v1924_v19, %v1960_v46  ;;  %v848_v52 = vsel %vm1936_vm2, %v1960_v46, %v1924_v19 }
 0x123   :  { %v1978_v53 = vadd.f32 %v238_v50, %v104_v6  ;;  %v240_v54 = vpop.f32.mrb[13].mxu0 }
 0x124   :  { %v1980_v55 = vadd.f32 %v240_v54, %v108_v7 }
 0x125   :  { %v423_v56 = vsel %vm1930_vm1, %v1918_v9, %v1978_v53  ;;  %v950_v57 = vsel %vm1930_vm1, %v1978_v53, %v1918_v9 }
 0x126   :  { %v244_v58 = vpop.f32.mrb[14].mxu0  ;;  %v424_v59 = vsel %vm1936_vm2, %v1920_v12, %v1980_v55  ;;  %v951_v60 = vsel %vm1936_vm2, %v1980_v55, %v1920_v12 }
 0x127   :  { %v2000_v62 = vadd.f32 %v244_v58, %v104_v6  ;;  %v246_v63 = vpop.f32.mrb[15].mxu0 }
 0x128   :  { %v2004_v2 = vadd.f32 %v246_v63, %v108_v7 }
 0x129   :  { %v315_v4 = vsel %vm1930_vm1, %v1998_v61, %v2000_v62  ;;  %v1053_v8 = vsel %vm1930_vm1, %v2000_v62, %v1998_v61  ;;  %v1157_v61 = vld [vmem:[%s2199_s5] sm:$0xff]  ;;  %v1159_v62 = vld [vmem:[%s2199_s5 + $0x10] sm:$0xff] }
 0x12a   :  { %v392_v10 = vadd.f32 %v387_v13, %v315_v4  ;;  %v316_v3 = vsel %vm1936_vm2, %v2002_v1, %v2004_v2  ;;  %v1054_v5 = vsel %vm1936_vm2, %v2004_v2, %v2002_v1  ;;  %v1740_v1 = vmov 0.0|0.0  }
 0x12b   :  { %v393_v6 = vadd.f32 %v389_v14, %v316_v3  ;;  %v1550_v2 = vpack.c.bf16 %v1158_v34, %v1157_v61 }
 0x12c   :  { %v1348_v7 = vmul.f32 -1.442695, %v392_v10 }
 0x12d   :  { %v1349_v20 = vmul.f32 -1.442695, %v393_v6 }
 0x12e   :  { %1588 = vpow2.f32 %v1348_v7 }
 0x12f   :  { %1590 = vtanh.f32 %v393_v6 }
 0x138   :  { %v1589_v11 = vpop.eup %1588 }
 0x139   :  { %v397_v15 = vadd.f32 1.0, %v1589_v11  ;;  %v1591_v17 = vpop.eup %1590 }
 0x13b   :  { %1592 = vrcp.f32 %v397_v15 }
 0x13c   :  { %1594 = vpow2.f32 %v1349_v20 }
 0x145   :  { %v1593_v18 = vpop.eup %1592 }
 0x146   :  { %v408_v13 = vmul.f32 %v1593_v18, %v1591_v17  ;;  %v1595_v22 = vpop.eup %1594  ;;  %v407_v26 = vmul.f32 0.0, %v1593_v18 }
 0x147   :  { %v404_v25 = vadd.f32 1.0, %v1595_v22 }
 0x148   :  { %410 = vrot.lane.b32.xlu0 %v408_v13, %s1739_s4 }
 0x149   :  { %1596 = vrcp.f32 %v404_v25 }
 0x153   :  { %v1597_v14 = vpop.eup %1596 }
 0x1ba   :  { %v411_v29 = vpop.permute.xlu0 %410 }
 0x1bb   :  { %v413_v33 = vadd.f32 %v411_v29, %v407_v26 }
 0x1bd   :  { %1598 = vtanh.f32 %v413_v33 }
 0x1c7   :  { %v1599_v39 = vpop.eup %1598 }
 0x1c8   :  { %v2023_v45 = vmul.f32 %v1599_v39, %v1597_v14 }
 0x1ca   :  { %426 = vrot.lane.b32.xlu0 %v2023_v45, %s1739_s4 }
 0x23c   :  { %v427_v50 = vpop.permute.xlu0 %426 }
 0x23d   :  { %1350 = vmatmul.mubr.msk.f32.vlgmr.msra.gmra.mrb[2].mxu1 %vm317_vm3, %v427_v50 }
 0x23e   :  { %1472 = vmatpush1.bf16.msra.mxu1 %v1836_v24  ;;  %712 = vmatprep.mubr.f32.mxu1 %v1738_v0 }
 0x23f   :  { %1474 = vmatprep.subr.bf16.mxu1 %v1839_v28 }
 0x242   :  { %1476 = vmatpush1.bf16.msra.mxu1 %v1843_v32 }
 0x243   :  { %1478 = vmatprep.subr.bf16.mxu1 %v1849_v35 }
 0x246   :  { %1480 = vmatpush1.bf16.msra.mxu1 %v1854_v41 }
 0x247   :  { %1482 = vmatprep.subr.bf16.mxu1 %v1860_v43 }
 0x24a   :  { %1484 = vmatpush1.bf16.msra.mxu1 %v1864_v48 }
 0x24b   :  { %1502 = vmatprep.subr.bf16.mxu1 %v1834_v21 }
 0x310   :  { %v496_v54 = vpop.f32.mrb[2].mxu1 }
 0x311   :  { %v501_v58 = vadd.f32 %v496_v54, %v423_v56  ;;  %v498_v63 = vpop.f32.mrb[3].mxu1 }
 0x312   :  { %v502_v4 = vadd.f32 %v498_v63, %v424_v59 }
 0x313   :  { %v1351_v10 = vmul.f32 -1.442695, %v501_v58 }
 0x314   :  { %v1352_v17 = vmul.f32 -1.442695, %v502_v4 }
 0x315   :  { %1600 = vpow2.f32 %v1351_v10 }
 0x316   :  { %1602 = vtanh.f32 %v502_v4 }
 0x31f   :  { %v1601_v3 = vpop.eup %1600 }
 0x320   :  { %v506_v6 = vadd.f32 1.0, %v1601_v3  ;;  %v1603_v7 = vpop.eup %1602 }
 0x322   :  { %1604 = vrcp.f32 %v506_v6 }
 0x323   :  { %1606 = vpow2.f32 %v1352_v17 }
 0x32c   :  { %v1605_v11 = vpop.eup %1604 }
 0x32d   :  { %v517_v15 = vmul.f32 %v1605_v11, %v1603_v7  ;;  %v1607_v18 = vpop.eup %1606  ;;  %v516_v20 = vmul.f32 %v1605_v11, %v413_v33 }
 0x32e   :  { %v513_v13 = vadd.f32 1.0, %v1607_v18 }
 0x32f   :  { %519 = vrot.lane.b32.xlu1 %v517_v15, %s1739_s4 }
 0x330   :  { %1608 = vrcp.f32 %v513_v13 }
 0x33a   :  { %v1609_v59 = vpop.eup %1608 }
 0x3a1   :  { %v520_v22 = vpop.permute.xlu1 %519 }
 0x3a2   :  { %v522_v56 = vadd.f32 %v520_v22, %v516_v20 }
 0x3a4   :  { %1610 = vtanh.f32 %v522_v56 }
 0x3ae   :  { %v1611_v25 = vpop.eup %1610 }
 0x3af   :  { %v524_v26 = vmul.f32 %v1611_v25, %v1609_v59 }
 0x3b1   :  { %535 = vrot.lane.b32.xlu1 %v524_v26, %s1739_s4  ;;  %v525_v13 = vadd.f32 %v524_v26, %v2023_v45 }
 0x423   :  { %v536_v29 = vpop.permute.xlu1 %535 }
 0x424   :  { %1353 = vmatmul.mubr.msk.f32.vlgmr.msra.gmra.mrb[16].mxu0 %vm317_vm3, %v536_v29 }
 0x425   :  { %1488 = vmatpush1.bf16.msra.mxu0 %v1836_v24  ;;  %815 = vmatprep.mubr.f32.mxu0 %v1738_v0 }
 0x426   :  { %1490 = vmatprep.subr.bf16.mxu0 %v1839_v28 }
 0x429   :  { %1492 = vmatpush1.bf16.msra.mxu0 %v1843_v32 }
 0x42a   :  { %1494 = vmatprep.subr.bf16.mxu0 %v1849_v35 }
 0x42d   :  { %1496 = vmatpush1.bf16.msra.mxu0 %v1854_v41 }
 0x42e   :  { %1498 = vmatprep.subr.bf16.mxu0 %v1860_v43 }
 0x431   :  { %1500 = vmatpush1.bf16.msra.mxu0 %v1864_v48 }
 0x432   :  { %1518 = vmatprep.subr.bf16.mxu0 %v1834_v21 }
 0x4f7   :  { %v605_v33 = vpop.f32.mrb[16].mxu0 }
 0x4f8   :  { %v610_v14 = vadd.f32 %v605_v33, %v532_v47  ;;  %v607_v39 = vpop.f32.mrb[17].mxu0 }
 0x4f9   :  { %v611_v50 = vadd.f32 %v607_v39, %v533_v51 }
 0x4fa   :  { %v1354_v54 = vmul.f32 -1.442695, %v610_v14 }
 0x4fb   :  { %v1355_v6 = vmul.f32 -1.442695, %v611_v50 }
 0x4fc   :  { %1612 = vpow2.f32 %v1354_v54 }
 0x4fd   :  { %1614 = vtanh.f32 %v611_v50 }
 0x506   :  { %v1613_v58 = vpop.eup %1612 }
 0x507   :  { %v615_v63 = vadd.f32 1.0, %v1613_v58  ;;  %v1615_v4 = vpop.eup %1614 }
 0x509   :  { %1616 = vrcp.f32 %v615_v63 }
 0x50a   :  { %1618 = vpow2.f32 %v1355_v6 }
 0x513   :  { %v1617_v10 = vpop.eup %1616 }
 0x514   :  { %v626_v3 = vmul.f32 %v1617_v10, %v1615_v4  ;;  %v1619_v47 = vpop.eup %1618  ;;  %v625_v11 = vmul.f32 %v1617_v10, %v522_v56 }
 0x515   :  { %v622_v7 = vadd.f32 1.0, %v1619_v47 }
 0x516   :  { %628 = vrot.lane.b32.xlu0 %v626_v3, %s1739_s4 }
 0x517   :  { %1620 = vrcp.f32 %v622_v7 }
 0x521   :  { %v1621_v51 = vpop.eup %1620 }
 0x588   :  { %v629_v15 = vpop.permute.xlu0 %628 }
 0x589   :  { %v631_v17 = vadd.f32 %v629_v15, %v625_v11 }
 0x58b   :  { %1622 = vtanh.f32 %v631_v17 }
 0x595   :  { %v1623_v18 = vpop.eup %1622 }
 0x596   :  { %v633_v20 = vmul.f32 %v1623_v18, %v1621_v51 }
 0x598   :  { %644 = vrot.lane.b32.xlu1 %v633_v20, %s1739_s4  ;;  %v634_v22 = vadd.f32 %v633_v20, %v525_v13 }
 0x60a   :  { %v645_v59 = vpop.permute.xlu1 %644 }
 0x60b   :  { %1356 = vmatmul.mubr.msk.f32.vlgmr.msra.gmra.mrb[4].mxu1 %vm317_vm3, %v645_v59 }
 0x60c   :  { %1504 = vmatpush1.bf16.msra.mxu1 %v1836_v24  ;;  %918 = vmatprep.mubr.f32.mxu1 %v1738_v0 }
 0x60d   :  { %1506 = vmatprep.subr.bf16.mxu1 %v1839_v28 }
 0x610   :  { %1508 = vmatpush1.bf16.msra.mxu1 %v1843_v32 }
 0x611   :  { %1510 = vmatprep.subr.bf16.mxu1 %v1849_v35 }
 0x614   :  { %1512 = vmatpush1.bf16.msra.mxu1 %v1854_v41 }
 0x615   :  { %1514 = vmatprep.subr.bf16.mxu1 %v1860_v43 }
 0x618   :  { %1516 = vmatpush1.bf16.msra.mxu1 %v1864_v48 }
 0x619   :  { %1534 = vmatprep.subr.bf16.mxu1 %v1834_v21 }
 0x6de   :  { %v714_v45 = vpop.f32.mrb[4].mxu1 }
 0x6df   :  { %v719_v56 = vadd.f32 %v714_v45, %v641_v37  ;;  %v716_v25 = vpop.f32.mrb[5].mxu1 }
 0x6e0   :  { %v720_v26 = vadd.f32 %v716_v25, %v642_v40 }
 0x6e1   :  { %v1357_v29 = vmul.f32 -1.442695, %v719_v56 }
 0x6e2   :  { %v1358_v54 = vmul.f32 -1.442695, %v720_v26 }
 0x6e3   :  { %1624 = vpow2.f32 %v1357_v29 }
 0x6e4   :  { %1626 = vtanh.f32 %v720_v26 }
 0x6ed   :  { %v1625_v33 = vpop.eup %1624 }
 0x6ee   :  { %v724_v14 = vadd.f32 1.0, %v1625_v33  ;;  %v1627_v21 = vpop.eup %1626 }
 0x6f0   :  { %1628 = vrcp.f32 %v724_v14 }
 0x6f1   :  { %1630 = vpow2.f32 %v1358_v54 }
 0x6fa   :  { %v1629_v39 = vpop.eup %1628 }
 0x6fb   :  { %v735_v50 = vmul.f32 %v1629_v39, %v1627_v21  ;;  %v1631_v37 = vpop.eup %1630  ;;  %v734_v63 = vmul.f32 %v1629_v39, %v631_v17 }
 0x6fc   :  { %v731_v58 = vadd.f32 1.0, %v1631_v37 }
 0x6fd   :  { %737 = vrot.lane.b32.xlu0 %v735_v50, %s1739_s4 }
 0x6fe   :  { %1632 = vrcp.f32 %v731_v58 }
 0x708   :  { %v1633_v40 = vpop.eup %1632 }
 0x76f   :  { %v738_v4 = vpop.permute.xlu0 %737 }
 0x770   :  { %v740_v10 = vadd.f32 %v738_v4, %v734_v63 }
 0x772   :  { %1634 = vtanh.f32 %v740_v10 }
 0x77c   :  { %v1635_v3 = vpop.eup %1634 }
 0x77d   :  { %v742_v6 = vmul.f32 %v1635_v3, %v1633_v40 }
 0x77f   :  { %747 = vrot.lane.b32.xlu1 %v742_v6, %s1739_s4  ;;  %v743_v47 = vadd.f32 %v742_v6, %v634_v22 }
 0x7f1   :  { %v748_v7 = vpop.permute.xlu1 %747 }
 0x7f2   :  { %1359 = vmatmul.mubr.msk.f32.vlgmr.msra.gmra.mrb[18].mxu0 %vm317_vm3, %v748_v7 }
 0x7f3   :  { %1520 = vmatpush1.bf16.msra.mxu0 %v1836_v24  ;;  %1021 = vmatprep.mubr.f32.mxu0 %v1738_v0 }
 0x7f4   :  { %1522 = vmatprep.subr.bf16.mxu0 %v1839_v28 }
 0x7f7   :  { %1524 = vmatpush1.bf16.msra.mxu0 %v1843_v32 }
 0x7f8   :  { %1526 = vmatprep.subr.bf16.mxu0 %v1849_v35 }
 0x7fb   :  { %1528 = vmatpush1.bf16.msra.mxu0 %v1854_v41 }
 0x7fc   :  { %1530 = vmatprep.subr.bf16.mxu0 %v1860_v43 }
 0x7ff   :  { %1532 = vmatpush1.bf16.msra.mxu0 %v1864_v48 }
 0x800   :  { %1549 = vmatprep.subr.bf16.mxu0 %v1740_v1 }
 0x8c5   :  { %v817_v11 = vpop.f32.mrb[18].mxu0 }
 0x8c6   :  { %v822_v15 = vadd.f32 %v817_v11, %v744_v38  ;;  %v819_v17 = vpop.f32.mrb[19].mxu0 }
 0x8c7   :  { %v823_v51 = vadd.f32 %v819_v17, %v745_v42 }
 0x8c8   :  { %v1360_v18 = vmul.f32 -1.442695, %v822_v15 }
 0x8c9   :  { %v1361_v23 = vmul.f32 -1.442695, %v823_v51 }
 0x8ca   :  { %1636 = vpow2.f32 %v1360_v18 }
 0x8cb   :  { %1638 = vtanh.f32 %v823_v51 }
 0x8d4   :  { %v1637_v13 = vpop.eup %1636 }
 0x8d5   :  { %v827_v20 = vadd.f32 1.0, %v1637_v13  ;;  %v1639_v22 = vpop.eup %1638 }
 0x8d7   :  { %1640 = vrcp.f32 %v827_v20 }
 0x8d8   :  { %1642 = vpow2.f32 %v1361_v23 }
 0x8e1   :  { %v1641_v59 = vpop.eup %1640 }
 0x8e2   :  { %v838_v45 = vmul.f32 %v1641_v59, %v1639_v22  ;;  %v1643_v31 = vpop.eup %1642  ;;  %v837_v56 = vmul.f32 %v1641_v59, %v740_v10 }
 0x8e3   :  { %v834_v38 = vadd.f32 1.0, %v1643_v31 }
 0x8e4   :  { %840 = vrot.lane.b32.xlu0 %v838_v45, %s1739_s4 }
 0x8e5   :  { %1644 = vrcp.f32 %v834_v38 }
 0x8ef   :  { %v1645_v27 = vpop.eup %1644 }
 0x956   :  { %v841_v25 = vpop.permute.xlu0 %840 }
 0x957   :  { %v843_v26 = vadd.f32 %v841_v25, %v837_v56 }
 0x959   :  { %1646 = vtanh.f32 %v843_v26 }
 0x963   :  { %v1647_v36 = vpop.eup %1646 }
 0x964   :  { %v845_v42 = vmul.f32 %v1647_v36, %v1645_v27  ;;  %v1161_v36 = vld [vmem:[%s2199_s5 + $0x20] sm:$0xff] }
 0x966   :  { %850 = vrot.lane.b32.xlu1 %v845_v42, %s1739_s4  ;;  %v846_v29 = vadd.f32 %v845_v42, %v743_v47  ;;  %v1162_v42 = vld [vmem:[%s2199_s5 + $0x28] sm:$0xff] }
 0x9d8   :  { %v851_v33 = vpop.permute.xlu1 %850 }
 0x9d9   :  { %1362 = vmatmul.mubr.msk.f32.vlgmr.msra.gmra.mrb[6].mxu1 %vm317_vm3, %v851_v33  ;;  %v1163_v33 = vld [vmem:[%s2199_s5 + $0x30] sm:$0xff] }
 0x9da   :  { %1536 = vmatpush1.bf16.msra.mxu1 %v1836_v24  ;;  %1124 = vmatprep.mubr.f32.mxu1 %v1738_v0 }
 0x9db   :  { %1538 = vmatprep.subr.bf16.mxu1 %v1839_v28 }
 0x9de   :  { %1540 = vmatpush1.bf16.msra.mxu1 %v1843_v32 }
 0x9df   :  { %1542 = vmatprep.subr.bf16.mxu1 %v1849_v35 }
 0x9e2   :  { %1544 = vmatpush1.bf16.msra.mxu1 %v1854_v41 }
 0x9e3   :  { %1546 = vmatprep.subr.bf16.mxu1 %v1860_v43 }
 0x9e6   :  { %1548 = vmatpush1.bf16.msra.mxu1 %v1864_v48 }
 0x9e7   :  { %1561 = vmatprep.subr.bf16.mxu1 %v1740_v1 }
 0xaac   :  { %v920_v14 = vpop.f32.mrb[6].mxu1 }
 0xaad   :  { %v925_v24 = vadd.f32 %v920_v14, %v847_v49  ;;  %v922_v21 = vpop.f32.mrb[7].mxu1 }
 0xaae   :  { %v926_v28 = vadd.f32 %v922_v21, %v848_v52 }
 0xaaf   :  { %v1363_v32 = vmul.f32 -1.442695, %v925_v24 }
 0xab0   :  { %v1364_v16 = vmul.f32 -1.442695, %v926_v28 }
 0xab1   :  { %1648 = vpow2.f32 %v1363_v32 }
 0xab2   :  { %1650 = vtanh.f32 %v926_v28 }
 0xabb   :  { %v1649_v35 = vpop.eup %1648 }
 0xabc   :  { %v930_v41 = vadd.f32 1.0, %v1649_v35  ;;  %v1651_v43 = vpop.eup %1650 }
 0xabe   :  { %1652 = vrcp.f32 %v930_v41 }
 0xabf   :  { %1654 = vpow2.f32 %v1364_v16 }
 0xac8   :  { %v1653_v48 = vpop.eup %1652 }
 0xac9   :  { %v941_v39 = vmul.f32 %v1653_v48, %v1651_v43  ;;  %v1655_v44 = vpop.eup %1654  ;;  %v940_v50 = vmul.f32 %v1653_v48, %v843_v26 }
 0xaca   :  { %v937_v49 = vadd.f32 1.0, %v1655_v44 }
 0xacb   :  { %943 = vrot.lane.b32.xlu0 %v941_v39, %s1739_s4 }
 0xacc   :  { %1656 = vrcp.f32 %v937_v49 }
 0xad6   :  { %v1657_v19 = vpop.eup %1656 }
 0xb3d   :  { %v944_v54 = vpop.permute.xlu0 %943 }
 0xb3e   :  { %v946_v37 = vadd.f32 %v944_v54, %v940_v50  ;;  %v1248_v50 = vld [vmem:[%s2201_s7] sm:$0xff]  ;;  %v1249_v54 = vld [vmem:[%s2201_s7 + $0x8] sm:$0xff] }
 0xb40   :  { %1658 = vtanh.f32 %v946_v37 }
 0xb4a   :  { %v1659_v46 = vpop.eup %1658 }
 0xb4b   :  { %v948_v52 = vmul.f32 %v1659_v46, %v1657_v19  ;;  %v1371_v19 = vld [vmem:[%s2200_s6] ss:$0 sm:$0xff] }
 0xb4d   :  { %953 = vrot.lane.b32.xlu1 %v948_v52, %s1739_s4  ;;  %v949_v58 = vadd.f32 %v948_v52, %v846_v29  ;;  %v1556_v29 = vpack.c.bf16 %v1162_v42, %v1161_v36 }
 0xbbf   :  { %v954_v63 = vpop.permute.xlu1 %953 }
 0xbc0   :  { %1365 = vmatmul.mubr.msk.f32.vlgmr.msra.gmra.mrb[20].mxu0 %vm317_vm3, %v954_v63 }
 0xbc1   :  { %1403 = vmatprep.mubr.msk.f32.mxu0 %vm1741_vm4, %v1738_v0  ;;  %1551 = vmatpush3.bf16.msra.mxu0 %v1550_v2 }
 0xbc2   :  { %1552 = vmatprep.subr.bf16.mxu0 %v1740_v1 }
 0xc93   :  { %v1023_v4 = vpop.f32.mrb[20].mxu0 }
 0xc94   :  { %v1028_v10 = vadd.f32 %v1023_v4, %v950_v57  ;;  %v1025_v40 = vpop.f32.mrb[21].mxu0  ;;  %v1373_v4 = vld [vmem:[%s2202_s8] ss:$0 sm:$0xff] }
 0xc95   :  { %v1029_v3 = vadd.f32 %v1025_v40, %v951_v60 }
 0xc96   :  { %v1366_v6 = vmul.f32 -1.442695, %v1028_v10 }
 0xc97   :  { %v1367_v9 = vmul.f32 -1.442695, %v1029_v3 }
 0xc98   :  { %1660 = vpow2.f32 %v1366_v6 }
 0xc99   :  { %1662 = vtanh.f32 %v1029_v3 }
 0xca2   :  { %v1661_v47 = vpop.eup %1660 }
 0xca3   :  { %v1033_v7 = vadd.f32 1.0, %v1661_v47  ;;  %v1663_v11 = vpop.eup %1662 }
 0xca5   :  { %1664 = vrcp.f32 %v1033_v7 }
 0xca6   :  { %1666 = vpow2.f32 %v1367_v9 }
 0xcaf   :  { %v1665_v15 = vpop.eup %1664 }
 0xcb0   :  { %v1044_v17 = vmul.f32 %v1665_v15, %v1663_v11  ;;  %v1667_v53 = vpop.eup %1666  ;;  %v1043_v51 = vmul.f32 %v1665_v15, %v946_v37  ;;  %v1562_v37 = vpack.c.bf16 %v1249_v54, %v1248_v50 }
 0xcb1   :  { %v1040_v57 = vadd.f32 1.0, %v1667_v53 }
 0xcb2   :  { %1046 = vrot.lane.b32.xlu0 %v1044_v17, %s1739_s4 }
 0xcb3   :  { %1668 = vrcp.f32 %v1040_v57 }
 0xcbd   :  { %v1669_v12 = vpop.eup %1668 }
 0xd24   :  { %v1047_v18 = vpop.permute.xlu0 %1046 }
 0xd25   :  { %v1049_v13 = vadd.f32 %v1047_v18, %v1043_v51 }
 0xd27   :  { %1670 = vtanh.f32 %v1049_v13 }
 0xd31   :  { %v1671_v55 = vpop.eup %1670 }
 0xd32   :  { %v1051_v60 = vmul.f32 %v1671_v55, %v1669_v12 }
 0xd34   :  { %1056 = vrot.lane.b32.xlu1 %v1051_v60, %s1739_s4  ;;  %v1052_v20 = vadd.f32 %v1051_v60, %v949_v58 }
 0xda6   :  { %v1057_v22 = vpop.permute.xlu1 %1056 }
 0xda7   :  { %1368 = vmatmul.mubr.msk.f32.vlgmr.msra.gmra.mrb[8].mxu1 %vm317_vm3, %v1057_v22 }
 0xda8   :  { %1410 = vmatprep.mubr.msk.f32.mxu1 %vm1741_vm4, %v1738_v0  ;;  %v1164_v0 = vld [vmem:[%s2199_s5 + $0x38] sm:$0xff]  ;;  %1563 = vmatpush3.bf16.msra.mxu1 %v1562_v37 }
 0xda9   :  { %v1559_v14 = vpack.c.bf16 %v1164_v0, %v1163_v33 }
 0xe7a   :  { %v1126_v59 = vpop.f32.mrb[8].mxu1 }
 0xe7b   :  { %v1131_v45 = vadd.f32 %v1126_v59, %v1053_v8  ;;  %v1128_v23 = vpop.f32.mrb[9].mxu1  ;;  %v1160_v8 = vld [vmem:[%s2199_s5 + $0x18] sm:$0xff] }
 0xe7c   :  { %v1132_v31 = vadd.f32 %v1128_v23, %v1054_v5  ;;  %v1553_v5 = vpack.c.bf16 %v1160_v8, %v1159_v62 }
 0xe7d   :  { %v1369_v38 = vmul.f32 -1.442695, %v1131_v45 }
 0xe7e   :  { %1554 = vmatpush3.bf16.msra.mxu0 %v1553_v5  ;;  %v1370_v24 = vmul.f32 -1.442695, %v1132_v31 }
 0xe7f   :  { %1672 = vpow2.f32 %v1369_v38  ;;  %1555 = vmatprep.subr.bf16.mxu0 %v1740_v1 }
 0xe80   :  { %1674 = vtanh.f32 %v1132_v31 }
 0xe82   :  { %1557 = vmatpush3.bf16.msra.mxu0 %v1556_v29 }
 0xe83   :  { %1558 = vmatprep.subr.bf16.mxu0 %v1740_v1 }
 0xe86   :  { %1560 = vmatpush3.bf16.msra.mxu0 %v1559_v14 }
 0xe89   :  { %v1673_v56 = vpop.eup %1672 }
 0xe8a   :  { %v1136_v25 = vadd.f32 1.0, %v1673_v56  ;;  %v1675_v26 = vpop.eup %1674 }
 0xe8c   :  { %1676 = vrcp.f32 %v1136_v25 }
 0xe8d   :  { %1678 = vpow2.f32 %v1370_v24 }
 0xe96   :  { %v1677_v27 = vpop.eup %1676 }
 0xe97   :  { %v1147_v30 = vmul.f32 %v1677_v27, %v1675_v26  ;;  %v1679_v21 = vpop.eup %1678  ;;  %v1146_v32 = vmul.f32 %v1677_v27, %v1049_v13 }
 0xe98   :  { %v1143_v28 = vadd.f32 1.0, %v1679_v21 }
 0xe99   :  { %1149 = vrot.lane.b32.xlu0 %v1147_v30, %s1739_s4 }
 0xe9a   :  { %1680 = vrcp.f32 %v1143_v28 }
 0xea4   :  { %v1681_v43 = vpop.eup %1680 }
 0xf0b   :  { %v1150_v35 = vpop.permute.xlu0 %1149 }
 0xf0c   :  { %v1152_v41 = vadd.f32 %v1150_v35, %v1146_v32 }
 0xf0e   :  { %1682 = vtanh.f32 %v1152_v41 }
 0xf18   :  { %v1683_v48 = vpop.eup %1682 }
 0xf19   :  { %v1154_v39 = vmul.f32 %v1683_v48, %v1681_v43 }
 0xf1b   :  { %v1155_v16 = vadd.f32 %v1154_v39, %v1052_v20 }
 0xf1d   :  { %v1156_v44 = vmul.f32 0.125, %v1155_v16 }
 0xf1f   :  { %1173 = vrot.lane.b32.xlu1 %v1156_v44, %s1739_s4 }
 0xf91   :  { %v1174_v49 = vpop.permute.xlu1 %1173 }
 0xf92   :  { %1404 = vmatmul.mubr.msk.f32.vlgmr.msra.gmra.mrb[22].mxu0 %vm317_vm3, %v1174_v49 }
0x1065   :  { %v1243_v46 = vpop.f32.mrb[22].mxu0 }
0x1066   :  { %v1244_v52 = vadd.f32 %v1371_v19, %v1243_v46  ;;  %v1405_v58 = vpop.f32.mrb[23].mxu0 }
0x1068   :  { %1684 = vtanh.f32 %v1244_v52 }
0x1072   :  { %v1685_v63 = vpop.eup %1684 }
0x1073   :  { %1411 = vmatmul.mubr.msk.f32.vlgmr.msra.gmra.mrb[10].mxu1 %vm1257_vm5, %v1685_v63 }
0x1146   :  { %v1327_v10 = vpop.f32.mrb[10].mxu1 }
0x1147   :  { %v1328_v40 = vadd.f32 %v1373_v4, %v1327_v10  ;;  %v1412_v3 = vpop.f32.mrb[11].mxu1 }
0x1149   :  { %1332 = vst.msk [vmem:[%s2203_s9] sm:$0xff] %vm1331_vm6, %v1328_v40 }
0x114a   :  { %1337 = vsyncpa [#allocation4], 1 }
0x114b   :  { %1338 = vsyncpa [#allocation6], 1 }

</bundles_post_ra>
